<compile_context>
chip_gen: v7x
topology: tpu7x:2x2x1
jax: 0.10.0
libtpu: 0.0.40
codegen_flags: <defaults>
</compile_context>

<pallas_src>
import numpy as np
import jax
import jax.numpy as jnp
from jax.experimental import pallas as pl
from jax.experimental.pallas import tpu as pltpu

# ---------------- sizes (small, consistent with the module) -----------------
N_NODES = 16             # nodes per graph
NODE_EMB = 8             # node feature size
NAV = 32                 # graph_emb_size == navigation space
HIDDEN = max(NAV // 2, 5)        # 16
LATENT = max(HIDDEN // 2, 5)     # 8
SIZE_LAYERS = (7, 7)             # GraphEmbed conv layer sizes
TAG_K = 2                        # TAGConv hops (DGL default)
NUM_DECISIONS = 4

LOG2PI = float(np.log2(np.pi))   # torch.log2(torch.Tensor([np.pi])) quirk of the module
BN_EPS = 1e-5
COS_EPS = 1e-6                   # nn.CosineSimilarity eps
PD_EPS = 1e-6                    # nn.PairwiseDistance eps

F32 = jnp.float32
S0, S1 = SIZE_LAYERS
TWO_N = 2 * N_NODES

PARAM_LANES = 128
OUT_ROWS, OUT_LANES = 8, 128     # single lane-dense output slab per pair


# ------------------------ packed parameter slab layout -----------------------
def _align8(n):
    return ((n + 7) // 8) * 8


# matrices: each starts on an 8-row boundary
_MATRIX_SPECS = [
    ("wg", (NODE_EMB, S0)),
    ("w_tag1", ((TAG_K + 1) * S0, S0)),   # stacked [w0; w1; w2]
    ("w_tag2", ((TAG_K + 1) * S0, S1)),
    ("wd", (S1, NAV)),
    ("we1", (NAV, HIDDEN)),
    ("we2", (HIDDEN, 2 * LATENT)),        # fused [we21 | we22]
    ("wd1", (LATENT, HIDDEN)),
    ("wd2", (HIDDEN, 2 * NAV)),           # fused [wd21 | wd22]
    ("wdec", (4, NUM_DECISIONS)),
    ("pool_bcast", (TWO_N, 2)),           # per-graph block indicator (broadcast back)
]
# one-row params packed densely (no per-param 8-row alignment)
_ROW_SPECS = [
    ("bg", (1, S0)), ("gamma1", (1, S0)), ("beta1", (1, S0)),
    ("gamma2", (1, S1)), ("beta2", (1, S1)),
    ("bd", (1, NAV)), ("be1", (1, HIDDEN)), ("be2", (1, 2 * LATENT)),
    ("bd1", (1, HIDDEN)), ("bd2", (1, 2 * NAV)), ("bdec", (1, NUM_DECISIONS)),
    ("pool_mean", (2, TWO_N)),            # per-graph mean-pool (1/N in block positions)
]

_PARAM_OFFSETS = {}
_row = 0
for _name, _shape in _MATRIX_SPECS:
    _PARAM_OFFSETS[_name] = (_row, _shape)
    _row += _align8(_shape[0])
for _name, _shape in _ROW_SPECS:
    _PARAM_OFFSETS[_name] = (_row, _shape)
    _row += _shape[0]
PARAM_ROWS = _align8(_row)                # 192 rows -> 96 KiB slab


def pack_params(ge, ce):
    """Pack all parameters (+ pooling constants) into one [PARAM_ROWS, 128] f32 slab."""
    n = lambda a: np.asarray(a, np.float32)

    pool_mean = np.zeros((2, TWO_N), np.float32)
    pool_mean[0, :N_NODES] = 1.0 / N_NODES
    pool_mean[1, N_NODES:] = 1.0 / N_NODES
    pool_bcast = np.zeros((TWO_N, 2), np.float32)
    pool_bcast[:N_NODES, 0] = 1.0
    pool_bcast[N_NODES:, 1] = 1.0

    flat = dict(
        wg=n(ge["wg"]), bg=n(ge["bg"]),
        w_tag1=n(ge["w_tag1"]).reshape((TAG_K + 1) * S0, S0),
        gamma1=n(ge["gamma1"]), beta1=n(ge["beta1"]),
        w_tag2=n(ge["w_tag2"]).reshape((TAG_K + 1) * S0, S1),
        gamma2=n(ge["gamma2"]), beta2=n(ge["beta2"]),
        wd=n(ge["wd"]), bd=n(ge["bd"]),
        we1=n(ce["we1"]), be1=n(ce["be1"]),
        we2=np.concatenate([n(ce["we21"]), n(ce["we22"])], axis=1),
        be2=np.concatenate([n(ce["be21"]), n(ce["be22"])], axis=1),
        wd1=n(ce["wd1"]), bd1=n(ce["bd1"]),
        wd2=np.concatenate([n(ce["wd21"]), n(ce["wd22"])], axis=1),
        bd2=np.concatenate([n(ce["bd21"]), n(ce["bd22"])], axis=1),
        wdec=n(ce["wdec"]), bdec=n(ce["bdec"]),
        pool_mean=pool_mean, pool_bcast=pool_bcast,
    )
    slab = np.zeros((PARAM_ROWS, PARAM_LANES), np.float32)
    for name, (off, (r, c)) in _PARAM_OFFSETS.items():
        arr = flat[name]
        assert arr.shape == (r, c), (name, arr.shape, (r, c))
        slab[off:off + r, :c] = arr
    return jnp.asarray(slab)


def _pslice(p_ref, name):
    off, (r, c) = _PARAM_OFFSETS[name]
    return p_ref[off:off + r, 0:c]        # static slice of the packed slab


# ============================== fused kernel =================================
def compass_fused_kernel(a_ref, x_ref, eps_ref, p_ref, out_ref):
    p = lambda name: _pslice(p_ref, name)
    a = a_ref[...]                        # [2N, 2N] block-diag normalized adjacency
    x = x_ref[...]                        # [2N, F]  stacked node features (g1 then g2)
    pool_mean = p("pool_mean")            # [2, 2N]  per-graph mean pooling
    pool_bcast = p("pool_bcast")          # [2N, 2]  broadcast per-graph stat to its nodes

    # ---------------- GraphEmbed on both graphs at once ----------------------
    # node gating: Linear + Sigmoid
    h = jax.nn.sigmoid(jnp.dot(x, p("wg"), preferred_element_type=F32) + p("bg"))

    def tag_bn_relu(h, w_stack, gamma, beta):
        # TAGConv (K=2, bias=False): [h | A.h | A^2.h] @ [w0; w1; w2]  -> one MXU dot
        h1 = jnp.dot(a, h, preferred_element_type=F32)
        h2 = jnp.dot(a, h1, preferred_element_type=F32)
        hcat = jnp.concatenate([h, h1, h2], axis=1)                  # [2N, 3*S_in]
        z = jnp.dot(hcat, w_stack, preferred_element_type=F32)       # [2N, S_out]
        # BatchNorm1d, training-mode batch stats computed PER GRAPH (the original
        # module embeds g_1 and g_2 in two separate forward calls).  Stats via tiny
        # pooling matmuls (MXU) instead of cross-sublane reductions + concat.
        m = jnp.dot(pool_bcast,
                    jnp.dot(pool_mean, z, preferred_element_type=F32),
                    preferred_element_type=F32)
        zc = z - m
        v = jnp.dot(pool_bcast,
                    jnp.dot(pool_mean, zc * zc, preferred_element_type=F32),
                    preferred_element_type=F32)                      # biased variance
        zn = zc * jax.lax.rsqrt(v + BN_EPS) * gamma + beta
        return jnp.maximum(zn, 0.0)                                  # ReLU

    h = tag_bn_relu(h, p("w_tag1"), p("gamma1"), p("beta1"))
    h = tag_bn_relu(h, p("w_tag2"), p("gamma2"), p("beta2"))

    # mean-pool each graph BEFORE the final dense (mean and affine commute)
    pooled = jnp.dot(pool_mean, h, preferred_element_type=F32)           # [2, S1]
    emb = jnp.dot(pooled, p("wd"), preferred_element_type=F32) + p("bd")  # [2, NAV]
    hg = emb[0:1, :]                                                      # g_1 embedding
    zg = emb[1:2, :]                                                      # g_2 embedding

    # ---------------- VAE encode / reparameterize / decode -------------------
    eps1 = eps_ref[0:1, 0:LATENT]                                         # [1, LATENT]
    eps2 = eps_ref[1:2, 0:NAV]                                            # [1, NAV]

    h1 = jnp.maximum(jnp.dot(hg, p("we1"), preferred_element_type=F32) + p("be1"), 0.0)
    enc = jnp.dot(h1, p("we2"), preferred_element_type=F32) + p("be2")    # [1, 2L]
    h_mu = enc[:, 0:LATENT]
    h_logvar = enc[:, LATENT:2 * LATENT]
    latent = h_mu + eps1 * jnp.exp(0.5 * h_logvar)

    d1 = jnp.maximum(jnp.dot(latent, p("wd1"), preferred_element_type=F32) + p("bd1"), 0.0)
    dec = jnp.dot(d1, p("wd2"), preferred_element_type=F32) + p("bd2")    # [1, 2*NAV]
    z_est_mu = dec[:, 0:NAV]
    z_est_logvar = dec[:, NAV:2 * NAV]
    z_estimate = z_est_mu + eps2 * jnp.exp(0.5 * z_est_logvar)

    # ---------------- compass.read(h, z_estimate) + navigate -----------------
    dot_hz = jnp.sum(hg * z_estimate, axis=1, keepdims=True)              # [1,1]
    nsq1 = jnp.sum(hg * hg, axis=1, keepdims=True)
    nsq2 = jnp.sum(z_estimate * z_estimate, axis=1, keepdims=True)
    # nn.CosineSimilarity clamps the PRODUCT of the norms (recent PyTorch semantics).
    d_cos = dot_hz / jnp.maximum(jnp.sqrt(nsq1 * nsq2), COS_EPS)
    diff = hg - z_estimate + PD_EPS                                       # PairwiseDistance eps
    d_pnorm = jnp.sqrt(jnp.sum(diff * diff, axis=1, keepdims=True))
    d_norm1 = jnp.sqrt(nsq1)       # torch.norm over whole tensor == row norm (1 row)
    d_norm2 = jnp.sqrt(nsq2)

    wdec = p("wdec")                                                      # [4, D]
    nav = (d_cos * wdec[0:1, :] + d_pnorm * wdec[1:2, :]
           + d_norm1 * wdec[2:3, :] + d_norm2 * wdec[3:4, :]) + p("bdec")

    # ---------------- losses --------------------------------------------------
    # (z - mu)^2 / (2 exp(logvar)) rewritten as 0.5*(z-mu)^2*exp(-logvar): exp -> EUP.
    loss_rec = LOG2PI + z_est_logvar + 0.5 * (zg - z_est_mu) ** 2 * jnp.exp(-z_est_logvar)
    kld = -0.5 * jnp.sum(1.0 + h_logvar - h_mu * h_mu - jnp.exp(h_logvar), keepdims=True)

    # ---------------- one packed lane-dense output slab, ONE full store ------
    def padrow(v, width):
        return jnp.concatenate(
            [v, jnp.zeros((v.shape[0], OUT_LANES - width), F32)], axis=1)

    out_ref[...] = jnp.concatenate([
        padrow(nav, NUM_DECISIONS),
        padrow(loss_rec, NAV),
        padrow(kld, 1),
        padrow(hg, NAV),
        padrow(zg, NAV),
        jnp.zeros((OUT_ROWS - 5, OUT_LANES), F32),
    ], axis=0)


# ============================== wrapper (glue) ================================
@jax.jit
def compass_encoder_forward(a_blk, x_blk, eps_all, param_slab):
    """a_blk: [B, 2N, 2N] block-diag normalized adjacency (pre-assembled),
       x_blk: [B, 2N, F] stacked node features, eps_all: [B, 2, NAV]."""
    B = a_blk.shape[0]
    out = pl.pallas_call(
        compass_fused_kernel,
        out_shape=jax.ShapeDtypeStruct((B, OUT_ROWS, OUT_LANES), F32),
        grid_spec=pltpu.PrefetchScalarGridSpec(
            num_scalar_prefetch=0,
            grid=(B,),
            in_specs=[
                pl.BlockSpec((None, TWO_N, TWO_N), lambda b: (b, 0, 0)),
                pl.BlockSpec((None, TWO_N, NODE_EMB), lambda b: (b, 0, 0)),
                pl.BlockSpec((None, 2, NAV), lambda b: (b, 0, 0)),
                # param slab: same block every step -> DMA'd once, VMEM-resident
                pl.BlockSpec((PARAM_ROWS, PARAM_LANES), lambda b: (0, 0)),
            ],
            out_specs=pl.BlockSpec((None, OUT_ROWS, OUT_LANES), lambda b: (b, 0, 0)),
        ),
        compiler_params=pltpu.CompilerParams(
            dimension_semantics=("parallel",)),   # v7x: shard batch over 2 TCs
    )(a_blk, x_blk, eps_all, param_slab)

    nav = out[:, 0, :NUM_DECISIONS]   # [B, num_decisions]  (compass.navigate)
    loss_rec = out[:, 1, :NAV]        # [B, G]
    kld = out[:, 2, 0]                # [B]
    h = out[:, 3, :NAV]               # [B, G] embedding of g_1 (for checks)
    z = out[:, 4, :NAV]               # [B, G] embedding of g_2 (for checks)
    return nav, loss_rec, kld, h, z


# ============================ pure-JAX reference ==============================
HP = jax.lax.Precision.HIGHEST


def graph_embed_ref(adj, x, p):
    h = jax.nn.sigmoid(jnp.dot(x, p["wg"], precision=HP) + p["bg"])

    def tag(h, w, gamma, beta):
        h1 = jnp.dot(adj, h, precision=HP)
        h2 = jnp.dot(adj, h1, precision=HP)
        z = (jnp.dot(h, w[0], precision=HP) + jnp.dot(h1, w[1], precision=HP)
             + jnp.dot(h2, w[2], precision=HP))
        m = jnp.mean(z, axis=0, keepdims=True)
        v = jnp.mean((z - m) ** 2, axis=0, keepdims=True)
        zn = (z - m) * jax.lax.rsqrt(v + BN_EPS) * gamma + beta
        return jnp.maximum(zn, 0.0)

    h = tag(h, p["w_tag1"], p["gamma1"], p["beta1"])
    h = tag(h, p["w_tag2"], p["gamma2"], p["beta2"])
    out = jnp.dot(h, p["wd"], precision=HP) + p["bd"]
    return jnp.mean(out, axis=0, keepdims=True)


def compass_encoder_ref(h, z, eps1, eps2, p):
    h1 = jnp.maximum(jnp.dot(h, p["we1"], precision=HP) + p["be1"], 0.0)
    h_mu = jnp.dot(h1, p["we21"], precision=HP) + p["be21"]
    h_logvar = jnp.dot(h1, p["we22"], precision=HP) + p["be22"]
    latent = h_mu + eps1 * jnp.exp(0.5 * h_logvar)
    d1 = jnp.maximum(jnp.dot(latent, p["wd1"], precision=HP) + p["bd1"], 0.0)
    z_est_mu = jnp.dot(d1, p["wd21"], precision=HP) + p["bd21"]
    z_est_logvar = jnp.dot(d1, p["wd22"], precision=HP) + p["bd22"]
    z_estimate = z_est_mu + eps2 * jnp.exp(0.5 * z_est_logvar)

    dot_hz = jnp.sum(h * z_estimate, axis=1, keepdims=True)
    nsq1 = jnp.sum(h * h, axis=1, keepdims=True)
    nsq2 = jnp.sum(z_estimate * z_estimate, axis=1, keepdims=True)
    d_cos = dot_hz / jnp.maximum(jnp.sqrt(nsq1 * nsq2), COS_EPS)
    diff = h - z_estimate + PD_EPS
    d_pnorm = jnp.sqrt(jnp.sum(diff * diff, axis=1, keepdims=True))
    d_norm1 = jnp.sqrt(jnp.sum(h * h)).reshape(1, 1)
    d_norm2 = jnp.sqrt(jnp.sum(z_estimate * z_estimate)).reshape(1, 1)
    needle = jnp.concatenate([d_cos, d_pnorm, d_norm1, d_norm2], axis=1)  # [1,4]
    nav = jnp.dot(needle, p["wdec"], precision=HP) + p["bdec"]
    loss_rec = LOG2PI + z_est_logvar + (z - z_est_mu) ** 2 / (2.0 * jnp.exp(z_est_logvar))
    kld = -0.5 * jnp.sum(1.0 + h_logvar - h_mu * h_mu - jnp.exp(h_logvar))
    return nav, loss_rec.reshape(-1), kld


# ============================== params / inputs ===============================
def init_params(key):
    ks = iter(jax.random.split(key, 32))

    def w(shape):
        fan_in = shape[-2] if len(shape) > 1 else shape[0]
        return (jax.random.normal(next(ks), shape, F32) / np.sqrt(fan_in)).astype(F32)

    def b(dim):
        return 0.01 * jax.random.normal(next(ks), (1, dim), F32)

    ge = dict(
        wg=w((NODE_EMB, S0)), bg=b(S0),
        w_tag1=w((TAG_K + 1, S0, S0)),
        gamma1=jnp.ones((1, S0), F32), beta1=jnp.zeros((1, S0), F32),
        w_tag2=w((TAG_K + 1, S0, S1)),
        gamma2=jnp.ones((1, S1), F32), beta2=jnp.zeros((1, S1), F32),
        wd=w((S1, NAV)), bd=b(NAV),
    )
    ce = dict(
        we1=w((NAV, HIDDEN)), be1=b(HIDDEN),
        we21=w((HIDDEN, LATENT)), be21=b(LATENT),
        we22=w((HIDDEN, LATENT)), be22=b(LATENT),
        wd1=w((LATENT, HIDDEN)), bd1=b(HIDDEN),
        wd21=w((HIDDEN, NAV)), bd21=b(NAV),
        wd22=w((HIDDEN, NAV)), bd22=b(NAV),
        wdec=w((4, NUM_DECISIONS)), bdec=b(NUM_DECISIONS),
    )
    return ge, ce


def ring_adjacency(n):
    a = np.zeros((n, n), np.float32)
    for i in range(n):
        a[i, (i + 1) % n] = 1.0
        a[i, (i - 1) % n] = 1.0
    deg = a.sum(1)
    d_inv_sqrt = 1.0 / np.sqrt(deg)
    return d_inv_sqrt[:, None] * a * d_inv_sqrt[None, :]


if __name__ == "__main__":
    root = jax.random.PRNGKey(0)
    k_par, k_x, k_eps = jax.random.split(root, 3)

    ge_params, ce_params = init_params(k_par)
    param_slab = pack_params(ge_params, ce_params)      # one 96 KiB slab, DMA'd once

    B = 4                                               # batch of graph pairs over the grid
    adj_np = ring_adjacency(N_NODES)

    # data prep (NOT in the per-call jit path): block-diag adjacency + stacked features
    a_blk_np = np.zeros((B, TWO_N, TWO_N), np.float32)
    a_blk_np[:, :N_NODES, :N_NODES] = adj_np
    a_blk_np[:, N_NODES:, N_NODES:] = adj_np
    a_blk = jnp.asarray(a_blk_np)

    x_pairs = jax.random.normal(k_x, (B, 2, N_NODES, NODE_EMB), F32)
    x_blk = jnp.reshape(x_pairs, (B, TWO_N, NODE_EMB))

    # TODO(synk): torch.randn_like lives inside the module (reparameterize); the normal
    # draws are generated here (glue) and fed to the kernel to keep things deterministic.
    k1, k2 = jax.random.split(k_eps)
    eps1 = jax.random.normal(k1, (B, 1, LATENT), F32)
    eps2 = jax.random.normal(k2, (B, 1, NAV), F32)
    eps_all = jnp.zeros((B, 2, NAV), F32)
    eps_all = eps_all.at[:, 0, :LATENT].set(eps1[:, 0])
    eps_all = eps_all.at[:, 1, :].set(eps2[:, 0])

    nav, loss_rec, kld, h, z = compass_encoder_forward(a_blk, x_blk, eps_all, param_slab)
    jax.block_until_ready((nav, loss_rec, kld, h, z))

    # sanity check every pair against a pure-JAX reference
    adj = jnp.asarray(adj_np)
    for bi in range(B):
        h_ref = graph_embed_ref(adj, x_pairs[bi, 0], ge_params)
        z_ref = graph_embed_ref(adj, x_pairs[bi, 1], ge_params)
        nav_r, loss_r, kld_r = compass_encoder_ref(h_ref, z_ref, eps1[bi], eps2[bi], ce_params)
        np.testing.assert_allclose(np.asarray(h[bi]), np.asarray(h_ref)[0], rtol=1e-2, atol=1e-2)
        np.testing.assert_allclose(np.asarray(z[bi]), np.asarray(z_ref)[0], rtol=1e-2, atol=1e-2)
        np.testing.assert_allclose(np.asarray(nav[bi]), np.asarray(nav_r)[0], rtol=1e-2, atol=1e-2)
        np.testing.assert_allclose(np.asarray(loss_rec[bi]), np.asarray(loss_r), rtol=1e-2, atol=1e-2)
        np.testing.assert_allclose(np.asarray(kld[bi]), np.asarray(kld_r), rtol=1e-2, atol=1e-2)

    print("KERNEL_OK")
</pallas_src>

<mosaic_0001>
module attributes {stable_mosaic.version = 11 : i64} {
  func.func @compass_fused_kernel(%arg0: i32, %arg1: memref<1x32x32xf32, #tpu.memory_space<vmem>>, %arg2: memref<1x32x8xf32, #tpu.memory_space<vmem>>, %arg3: memref<1x2x32xf32, #tpu.memory_space<vmem>>, %arg4: memref<192x128xf32, #tpu.memory_space<vmem>>, %arg5: memref<1x8x128xf32, #tpu.memory_space<vmem>>) attributes {dimension_semantics = [#tpu.dimension_semantics<parallel>], iteration_bounds = array<i64: 4>, scalar_prefetch = 0 : i64, scratch_operands = 0 : i64, tpu.core_type = #tpu.core_type<tc>, window_params = [{transform_indices = @transform_0, window_bounds = array<i64: 1, 32, 32>}, {transform_indices = @transform_1, window_bounds = array<i64: 1, 32, 8>}, {transform_indices = @transform_2, window_bounds = array<i64: 1, 2, 32>}, {pipeline_mode = #tpu.pipeline_mode<synchronous>, transform_indices = @transform_3, window_bounds = array<i64: 192, 128>}, {transform_indices = @transform_4, window_bounds = array<i64: 1, 8, 128>}]} {
    %c0 = arith.constant 0 : index
    %c0_0 = arith.constant 0 : index
    %c0_1 = arith.constant 0 : index
    %0 = vector.load %arg1[%c0, %c0_0, %c0_1] : memref<1x32x32xf32, #tpu.memory_space<vmem>>, vector<1x32x32xf32>
    %1 = vector.shape_cast %0 : vector<1x32x32xf32> to vector<32x32xf32>
    %c0_2 = arith.constant 0 : index
    %c0_3 = arith.constant 0 : index
    %c0_4 = arith.constant 0 : index
    %2 = vector.load %arg2[%c0_2, %c0_3, %c0_4] : memref<1x32x8xf32, #tpu.memory_space<vmem>>, vector<1x32x8xf32>
    %3 = vector.shape_cast %2 : vector<1x32x8xf32> to vector<32x8xf32>
    %c187 = arith.constant 187 : index
    %c0_5 = arith.constant 0 : index
    %4 = vector.load %arg4[%c187, %c0_5] : memref<192x128xf32, #tpu.memory_space<vmem>>, vector<2x32xf32>
    %c144 = arith.constant 144 : index
    %c0_6 = arith.constant 0 : index
    %5 = vector.load %arg4[%c144, %c0_6] : memref<192x128xf32, #tpu.memory_space<vmem>>, vector<32x2xf32>
    %c0_7 = arith.constant 0 : index
    %c0_8 = arith.constant 0 : index
    %6 = vector.load %arg4[%c0_7, %c0_8] : memref<192x128xf32, #tpu.memory_space<vmem>>, vector<8x7xf32>
    %cst = arith.constant dense<0.000000e+00> : vector<32x7xf32>
    %7 = tpu.matmul %3, %6, %cst {dimension_numbers = #tpu.dot_dimension_numbers<[1], [0], [0], [1], [0, 0, 1, 1], [], []>} : vector<32x8xf32>, vector<8x7xf32>, vector<32x7xf32> -> vector<32x7xf32>
    %c176 = arith.constant 176 : index
    %c0_9 = arith.constant 0 : index
    %8 = vector.load %arg4[%c176, %c0_9] : memref<192x128xf32, #tpu.memory_space<vmem>>, vector<1x7xf32>
    %9 = vector.broadcast %8 : vector<1x7xf32> to vector<32x7xf32>
    %10 = arith.addf %7, %9 : vector<32x7xf32>
    %11 = arith.negf %10 : vector<32x7xf32>
    %12 = math.exp %11 : vector<32x7xf32>
    %cst_10 = arith.constant 1.000000e+00 : f32
    %13 = vector.broadcast %cst_10 : f32 to vector<32x7xf32>
    %14 = arith.addf %13, %12 : vector<32x7xf32>
    %15 = arith.divf %13, %14 : vector<32x7xf32>
    %c8 = arith.constant 8 : index
    %c0_11 = arith.constant 0 : index
    %16 = vector.load %arg4[%c8, %c0_11] : memref<192x128xf32, #tpu.memory_space<vmem>>, vector<21x7xf32>
    %c177 = arith.constant 177 : index
    %c0_12 = arith.constant 0 : index
    %17 = vector.load %arg4[%c177, %c0_12] : memref<192x128xf32, #tpu.memory_space<vmem>>, vector<1x7xf32>
    %c178 = arith.constant 178 : index
    %c0_13 = arith.constant 0 : index
    %18 = vector.load %arg4[%c178, %c0_13] : memref<192x128xf32, #tpu.memory_space<vmem>>, vector<1x7xf32>
    %cst_14 = arith.constant dense<0.000000e+00> : vector<32x7xf32>
    %19 = tpu.matmul %1, %15, %cst_14 {dimension_numbers = #tpu.dot_dimension_numbers<[1], [0], [0], [1], [0, 0, 1, 1], [], []>} : vector<32x32xf32>, vector<32x7xf32>, vector<32x7xf32> -> vector<32x7xf32>
    %cst_15 = arith.constant dense<0.000000e+00> : vector<32x7xf32>
    %20 = tpu.matmul %1, %19, %cst_15 {dimension_numbers = #tpu.dot_dimension_numbers<[1], [0], [0], [1], [0, 0, 1, 1], [], []>} : vector<32x32xf32>, vector<32x7xf32>, vector<32x7xf32> -> vector<32x7xf32>
    %21 = tpu.concatenate %15, %19, %20 in 1 : vector<32x7xf32>, vector<32x7xf32>, vector<32x7xf32> -> vector<32x21xf32>
    %cst_16 = arith.constant dense<0.000000e+00> : vector<32x7xf32>
    %22 = tpu.matmul %21, %16, %cst_16 {dimension_numbers = #tpu.dot_dimension_numbers<[1], [0], [0], [1], [0, 0, 1, 1], [], []>} : vector<32x21xf32>, vector<21x7xf32>, vector<32x7xf32> -> vector<32x7xf32>
    %cst_17 = arith.constant dense<0.000000e+00> : vector<2x7xf32>
    %23 = tpu.matmul %4, %22, %cst_17 {dimension_numbers = #tpu.dot_dimension_numbers<[1], [0], [0], [1], [0, 0, 1, 1], [], []>} : vector<2x32xf32>, vector<32x7xf32>, vector<2x7xf32> -> vector<2x7xf32>
    %cst_18 = arith.constant dense<0.000000e+00> : vector<32x7xf32>
    %24 = tpu.matmul %5, %23, %cst_18 {dimension_numbers = #tpu.dot_dimension_numbers<[1], [0], [0], [1], [0, 0, 1, 1], [], []>} : vector<32x2xf32>, vector<2x7xf32>, vector<32x7xf32> -> vector<32x7xf32>
    %25 = arith.subf %22, %24 : vector<32x7xf32>
    %26 = arith.mulf %25, %25 : vector<32x7xf32>
    %cst_19 = arith.constant dense<0.000000e+00> : vector<2x7xf32>
    %27 = tpu.matmul %4, %26, %cst_19 {dimension_numbers = #tpu.dot_dimension_numbers<[1], [0], [0], [1], [0, 0, 1, 1], [], []>} : vector<2x32xf32>, vector<32x7xf32>, vector<2x7xf32> -> vector<2x7xf32>
    %cst_20 = arith.constant dense<0.000000e+00> : vector<32x7xf32>
    %28 = tpu.matmul %5, %27, %cst_20 {dimension_numbers = #tpu.dot_dimension_numbers<[1], [0], [0], [1], [0, 0, 1, 1], [], []>} : vector<32x2xf32>, vector<2x7xf32>, vector<32x7xf32> -> vector<32x7xf32>
    %cst_21 = arith.constant 9.99999974E-6 : f32
    %29 = vector.broadcast %cst_21 : f32 to vector<32x7xf32>
    %30 = arith.addf %28, %29 : vector<32x7xf32>
    %31 = math.rsqrt %30 : vector<32x7xf32>
    %32 = arith.mulf %25, %31 : vector<32x7xf32>
    %33 = vector.broadcast %17 : vector<1x7xf32> to vector<32x7xf32>
    %34 = arith.mulf %32, %33 : vector<32x7xf32>
    %35 = vector.broadcast %18 : vector<1x7xf32> to vector<32x7xf32>
    %36 = arith.addf %34, %35 : vector<32x7xf32>
    %cst_22 = arith.constant 0.000000e+00 : f32
    %37 = vector.broadcast %cst_22 : f32 to vector<32x7xf32>
    %38 = arith.maximumf %36, %37 : vector<32x7xf32>
    %c32 = arith.constant 32 : index
    %c0_23 = arith.constant 0 : index
    %39 = vector.load %arg4[%c32, %c0_23] : memref<192x128xf32, #tpu.memory_space<vmem>>, vector<21x7xf32>
    %c179 = arith.constant 179 : index
    %c0_24 = arith.constant 0 : index
    %40 = vector.load %arg4[%c179, %c0_24] : memref<192x128xf32, #tpu.memory_space<vmem>>, vector<1x7xf32>
    %c180 = arith.constant 180 : index
    %c0_25 = arith.constant 0 : index
    %41 = vector.load %arg4[%c180, %c0_25] : memref<192x128xf32, #tpu.memory_space<vmem>>, vector<1x7xf32>
    %cst_26 = arith.constant dense<0.000000e+00> : vector<32x7xf32>
    %42 = tpu.matmul %1, %38, %cst_26 {dimension_numbers = #tpu.dot_dimension_numbers<[1], [0], [0], [1], [0, 0, 1, 1], [], []>} : vector<32x32xf32>, vector<32x7xf32>, vector<32x7xf32> -> vector<32x7xf32>
    %cst_27 = arith.constant dense<0.000000e+00> : vector<32x7xf32>
    %43 = tpu.matmul %1, %42, %cst_27 {dimension_numbers = #tpu.dot_dimension_numbers<[1], [0], [0], [1], [0, 0, 1, 1], [], []>} : vector<32x32xf32>, vector<32x7xf32>, vector<32x7xf32> -> vector<32x7xf32>
    %44 = tpu.concatenate %38, %42, %43 in 1 : vector<32x7xf32>, vector<32x7xf32>, vector<32x7xf32> -> vector<32x21xf32>
    %cst_28 = arith.constant dense<0.000000e+00> : vector<32x7xf32>
    %45 = tpu.matmul %44, %39, %cst_28 {dimension_numbers = #tpu.dot_dimension_numbers<[1], [0], [0], [1], [0, 0, 1, 1], [], []>} : vector<32x21xf32>, vector<21x7xf32>, vector<32x7xf32> -> vector<32x7xf32>
    %cst_29 = arith.constant dense<0.000000e+00> : vector<2x7xf32>
    %46 = tpu.matmul %4, %45, %cst_29 {dimension_numbers = #tpu.dot_dimension_numbers<[1], [0], [0], [1], [0, 0, 1, 1], [], []>} : vector<2x32xf32>, vector<32x7xf32>, vector<2x7xf32> -> vector<2x7xf32>
    %cst_30 = arith.constant dense<0.000000e+00> : vector<32x7xf32>
    %47 = tpu.matmul %5, %46, %cst_30 {dimension_numbers = #tpu.dot_dimension_numbers<[1], [0], [0], [1], [0, 0, 1, 1], [], []>} : vector<32x2xf32>, vector<2x7xf32>, vector<32x7xf32> -> vector<32x7xf32>
    %48 = arith.subf %45, %47 : vector<32x7xf32>
    %49 = arith.mulf %48, %48 : vector<32x7xf32>
    %cst_31 = arith.constant dense<0.000000e+00> : vector<2x7xf32>
    %50 = tpu.matmul %4, %49, %cst_31 {dimension_numbers = #tpu.dot_dimension_numbers<[1], [0], [0], [1], [0, 0, 1, 1], [], []>} : vector<2x32xf32>, vector<32x7xf32>, vector<2x7xf32> -> vector<2x7xf32>
    %cst_32 = arith.constant dense<0.000000e+00> : vector<32x7xf32>
    %51 = tpu.matmul %5, %50, %cst_32 {dimension_numbers = #tpu.dot_dimension_numbers<[1], [0], [0], [1], [0, 0, 1, 1], [], []>} : vector<32x2xf32>, vector<2x7xf32>, vector<32x7xf32> -> vector<32x7xf32>
    %cst_33 = arith.constant 9.99999974E-6 : f32
    %52 = vector.broadcast %cst_33 : f32 to vector<32x7xf32>
    %53 = arith.addf %51, %52 : vector<32x7xf32>
    %54 = math.rsqrt %53 : vector<32x7xf32>
    %55 = arith.mulf %48, %54 : vector<32x7xf32>
    %56 = vector.broadcast %40 : vector<1x7xf32> to vector<32x7xf32>
    %57 = arith.mulf %55, %56 : vector<32x7xf32>
    %58 = vector.broadcast %41 : vector<1x7xf32> to vector<32x7xf32>
    %59 = arith.addf %57, %58 : vector<32x7xf32>
    %cst_34 = arith.constant 0.000000e+00 : f32
    %60 = vector.broadcast %cst_34 : f32 to vector<32x7xf32>
    %61 = arith.maximumf %59, %60 : vector<32x7xf32>
    %cst_35 = arith.constant dense<0.000000e+00> : vector<2x7xf32>
    %62 = tpu.matmul %4, %61, %cst_35 {dimension_numbers = #tpu.dot_dimension_numbers<[1], [0], [0], [1], [0, 0, 1, 1], [], []>} : vector<2x32xf32>, vector<32x7xf32>, vector<2x7xf32> -> vector<2x7xf32>
    %c56 = arith.constant 56 : index
    %c0_36 = arith.constant 0 : index
    %63 = vector.load %arg4[%c56, %c0_36] : memref<192x128xf32, #tpu.memory_space<vmem>>, vector<7x32xf32>
    %cst_37 = arith.constant dense<0.000000e+00> : vector<2x32xf32>
    %64 = tpu.matmul %62, %63, %cst_37 {dimension_numbers = #tpu.dot_dimension_numbers<[1], [0], [0], [1], [0, 0, 1, 1], [], []>} : vector<2x7xf32>, vector<7x32xf32>, vector<2x32xf32> -> vector<2x32xf32>
    %c181 = arith.constant 181 : index
    %c0_38 = arith.constant 0 : index
    %65 = vector.load %arg4[%c181, %c0_38] : memref<192x128xf32, #tpu.memory_space<vmem>>, vector<1x32xf32>
    %66 = vector.broadcast %65 : vector<1x32xf32> to vector<2x32xf32>
    %67 = arith.addf %64, %66 : vector<2x32xf32>
    %68 = vector.extract_strided_slice %67 {offsets = [0, 0], sizes = [1, 32], strides = [1, 1]} : vector<2x32xf32> to vector<1x32xf32>
    %69 = vector.extract_strided_slice %67 {offsets = [1, 0], sizes = [1, 32], strides = [1, 1]} : vector<2x32xf32> to vector<1x32xf32>
    %c0_39 = arith.constant 0 : index
    %c0_40 = arith.constant 0 : index
    %c0_41 = arith.constant 0 : index
    %70 = vector.load %arg3[%c0_39, %c0_40, %c0_41] : memref<1x2x32xf32, #tpu.memory_space<vmem>>, vector<1x1x8xf32>
    %71 = vector.shape_cast %70 : vector<1x1x8xf32> to vector<1x8xf32>
    %c0_42 = arith.constant 0 : index
    %c1 = arith.constant 1 : index
    %c0_43 = arith.constant 0 : index
    %72 = vector.load %arg3[%c0_42, %c1, %c0_43] : memref<1x2x32xf32, #tpu.memory_space<vmem>>, vector<1x1x32xf32>
    %73 = vector.shape_cast %72 : vector<1x1x32xf32> to vector<1x32xf32>
    %c64 = arith.constant 64 : index
    %c0_44 = arith.constant 0 : index
    %74 = vector.load %arg4[%c64, %c0_44] : memref<192x128xf32, #tpu.memory_space<vmem>>, vector<32x16xf32>
    %cst_45 = arith.constant dense<0.000000e+00> : vector<1x16xf32>
    %75 = tpu.matmul %68, %74, %cst_45 {dimension_numbers = #tpu.dot_dimension_numbers<[1], [0], [0], [1], [0, 0, 1, 1], [], []>} : vector<1x32xf32>, vector<32x16xf32>, vector<1x16xf32> -> vector<1x16xf32>
    %c182 = arith.constant 182 : index
    %c0_46 = arith.constant 0 : index
    %76 = vector.load %arg4[%c182, %c0_46] : memref<192x128xf32, #tpu.memory_space<vmem>>, vector<1x16xf32>
    %77 = arith.addf %75, %76 : vector<1x16xf32>
    %cst_47 = arith.constant 0.000000e+00 : f32
    %78 = vector.broadcast %cst_47 : f32 to vector<1x16xf32>
    %79 = arith.maximumf %77, %78 : vector<1x16xf32>
    %c96 = arith.constant 96 : index
    %c0_48 = arith.constant 0 : index
    %80 = vector.load %arg4[%c96, %c0_48] : memref<192x128xf32, #tpu.memory_space<vmem>>, vector<16x16xf32>
    %cst_49 = arith.constant dense<0.000000e+00> : vector<1x16xf32>
    %81 = tpu.matmul %79, %80, %cst_49 {dimension_numbers = #tpu.dot_dimension_numbers<[1], [0], [0], [1], [0, 0, 1, 1], [], []>} : vector<1x16xf32>, vector<16x16xf32>, vector<1x16xf32> -> vector<1x16xf32>
    %c183 = arith.constant 183 : index
    %c0_50 = arith.constant 0 : index
    %82 = vector.load %arg4[%c183, %c0_50] : memref<192x128xf32, #tpu.memory_space<vmem>>, vector<1x16xf32>
    %83 = arith.addf %81, %82 : vector<1x16xf32>
    %84 = vector.extract_strided_slice %83 {offsets = [0, 0], sizes = [1, 8], strides = [1, 1]} : vector<1x16xf32> to vector<1x8xf32>
    %85 = vector.extract_strided_slice %83 {offsets = [0, 8], sizes = [1, 8], strides = [1, 1]} : vector<1x16xf32> to vector<1x8xf32>
    %cst_51 = arith.constant 5.000000e-01 : f32
    %86 = vector.broadcast %cst_51 : f32 to vector<1x8xf32>
    %87 = arith.mulf %86, %85 : vector<1x8xf32>
    %88 = math.exp %87 : vector<1x8xf32>
    %89 = arith.mulf %71, %88 : vector<1x8xf32>
    %90 = arith.addf %84, %89 : vector<1x8xf32>
    %c112 = arith.constant 112 : index
    %c0_52 = arith.constant 0 : index
    %91 = vector.load %arg4[%c112, %c0_52] : memref<192x128xf32, #tpu.memory_space<vmem>>, vector<8x16xf32>
    %cst_53 = arith.constant dense<0.000000e+00> : vector<1x16xf32>
    %92 = tpu.matmul %90, %91, %cst_53 {dimension_numbers = #tpu.dot_dimension_numbers<[1], [0], [0], [1], [0, 0, 1, 1], [], []>} : vector<1x8xf32>, vector<8x16xf32>, vector<1x16xf32> -> vector<1x16xf32>
    %c184 = arith.constant 184 : index
    %c0_54 = arith.constant 0 : index
    %93 = vector.load %arg4[%c184, %c0_54] : memref<192x128xf32, #tpu.memory_space<vmem>>, vector<1x16xf32>
    %94 = arith.addf %92, %93 : vector<1x16xf32>
    %cst_55 = arith.constant 0.000000e+00 : f32
    %95 = vector.broadcast %cst_55 : f32 to vector<1x16xf32>
    %96 = arith.maximumf %94, %95 : vector<1x16xf32>
    %c120 = arith.constant 120 : index
    %c0_56 = arith.constant 0 : index
    %97 = vector.load %arg4[%c120, %c0_56] : memref<192x128xf32, #tpu.memory_space<vmem>>, vector<16x64xf32>
    %cst_57 = arith.constant dense<0.000000e+00> : vector<1x64xf32>
    %98 = tpu.matmul %96, %97, %cst_57 {dimension_numbers = #tpu.dot_dimension_numbers<[1], [0], [0], [1], [0, 0, 1, 1], [], []>} : vector<1x16xf32>, vector<16x64xf32>, vector<1x64xf32> -> vector<1x64xf32>
    %c185 = arith.constant 185 : index
    %c0_58 = arith.constant 0 : index
    %99 = vector.load %arg4[%c185, %c0_58] : memref<192x128xf32, #tpu.memory_space<vmem>>, vector<1x64xf32>
    %100 = arith.addf %98, %99 : vector<1x64xf32>
    %101 = vector.extract_strided_slice %100 {offsets = [0, 0], sizes = [1, 32], strides = [1, 1]} : vector<1x64xf32> to vector<1x32xf32>
    %102 = vector.extract_strided_slice %100 {offsets = [0, 32], sizes = [1, 32], strides = [1, 1]} : vector<1x64xf32> to vector<1x32xf32>
    %cst_59 = arith.constant 5.000000e-01 : f32
    %103 = vector.broadcast %cst_59 : f32 to vector<1x32xf32>
    %104 = arith.mulf %103, %102 : vector<1x32xf32>
    %105 = math.exp %104 : vector<1x32xf32>
    %106 = arith.mulf %73, %105 : vector<1x32xf32>
    %107 = arith.addf %101, %106 : vector<1x32xf32>
    %108 = arith.mulf %68, %107 : vector<1x32xf32>
    %cst_60 = arith.constant dense<0.000000e+00> : vector<1xf32>
    %109 = vector.multi_reduction <add>, %108, %cst_60 [1] : vector<1x32xf32> to vector<1xf32>
    %110 = vector.shape_cast %109 : vector<1xf32> to vector<1x1xf32>
    %111 = arith.mulf %68, %68 : vector<1x32xf32>
    %cst_61 = arith.constant dense<0.000000e+00> : vector<1xf32>
    %112 = vector.multi_reduction <add>, %111, %cst_61 [1] : vector<1x32xf32> to vector<1xf32>
    %113 = vector.shape_cast %112 : vector<1xf32> to vector<1x1xf32>
    %114 = arith.mulf %107, %107 : vector<1x32xf32>
    %cst_62 = arith.constant dense<0.000000e+00> : vector<1xf32>
    %115 = vector.multi_reduction <add>, %114, %cst_62 [1] : vector<1x32xf32> to vector<1xf32>
    %116 = vector.shape_cast %115 : vector<1xf32> to vector<1x1xf32>
    %117 = arith.mulf %113, %116 : vector<1x1xf32>
    %118 = math.sqrt %117 : vector<1x1xf32>
    %cst_63 = arith.constant 9.99999997E-7 : f32
    %119 = vector.broadcast %cst_63 : f32 to vector<1x1xf32>
    %120 = arith.maximumf %118, %119 : vector<1x1xf32>
    %121 = arith.divf %110, %120 : vector<1x1xf32>
    %122 = arith.subf %68, %107 : vector<1x32xf32>
    %cst_64 = arith.constant 9.99999997E-7 : f32
    %123 = vector.broadcast %cst_64 : f32 to vector<1x32xf32>
    %124 = arith.addf %122, %123 : vector<1x32xf32>
    %125 = arith.mulf %124, %124 : vector<1x32xf32>
    %cst_65 = arith.constant dense<0.000000e+00> : vector<1xf32>
    %126 = vector.multi_reduction <add>, %125, %cst_65 [1] : vector<1x32xf32> to vector<1xf32>
    %127 = vector.shape_cast %126 : vector<1xf32> to vector<1x1xf32>
    %128 = math.sqrt %127 : vector<1x1xf32>
    %129 = math.sqrt %113 : vector<1x1xf32>
    %130 = math.sqrt %116 : vector<1x1xf32>
    %c136 = arith.constant 136 : index
    %c0_66 = arith.constant 0 : index
    %131 = vector.load %arg4[%c136, %c0_66] : memref<192x128xf32, #tpu.memory_space<vmem>>, vector<4x4xf32>
    %132 = vector.extract_strided_slice %131 {offsets = [0, 0], sizes = [1, 4], strides = [1, 1]} : vector<4x4xf32> to vector<1x4xf32>
    %133 = vector.broadcast %121 : vector<1x1xf32> to vector<1x4xf32>
    %134 = arith.mulf %133, %132 : vector<1x4xf32>
    %135 = vector.extract_strided_slice %131 {offsets = [1, 0], sizes = [1, 4], strides = [1, 1]} : vector<4x4xf32> to vector<1x4xf32>
    %136 = vector.broadcast %128 : vector<1x1xf32> to vector<1x4xf32>
    %137 = arith.mulf %136, %135 : vector<1x4xf32>
    %138 = arith.addf %134, %137 : vector<1x4xf32>
    %139 = vector.extract_strided_slice %131 {offsets = [2, 0], sizes = [1, 4], strides = [1, 1]} : vector<4x4xf32> to vector<1x4xf32>
    %140 = vector.broadcast %129 : vector<1x1xf32> to vector<1x4xf32>
    %141 = arith.mulf %140, %139 : vector<1x4xf32>
    %142 = arith.addf %138, %141 : vector<1x4xf32>
    %143 = vector.extract_strided_slice %131 {offsets = [3, 0], sizes = [1, 4], strides = [1, 1]} : vector<4x4xf32> to vector<1x4xf32>
    %144 = vector.broadcast %130 : vector<1x1xf32> to vector<1x4xf32>
    %145 = arith.mulf %144, %143 : vector<1x4xf32>
    %146 = arith.addf %142, %145 : vector<1x4xf32>
    %c186 = arith.constant 186 : index
    %c0_67 = arith.constant 0 : index
    %147 = vector.load %arg4[%c186, %c0_67] : memref<192x128xf32, #tpu.memory_space<vmem>>, vector<1x4xf32>
    %148 = arith.addf %146, %147 : vector<1x4xf32>
    %cst_68 = arith.constant 1.65149617 : f32
    %149 = vector.broadcast %cst_68 : f32 to vector<1x32xf32>
    %150 = arith.addf %149, %102 : vector<1x32xf32>
    %151 = arith.subf %69, %101 : vector<1x32xf32>
    %152 = arith.mulf %151, %151 : vector<1x32xf32>
    %cst_69 = arith.constant 5.000000e-01 : f32
    %153 = vector.broadcast %cst_69 : f32 to vector<1x32xf32>
    %154 = arith.mulf %153, %152 : vector<1x32xf32>
    %cst_70 = arith.constant 0.000000e+00 : f32
    %155 = vector.broadcast %cst_70 : f32 to vector<1x32xf32>
    %156 = arith.subf %155, %102 : vector<1x32xf32>
    %157 = math.exp %156 : vector<1x32xf32>
    %158 = arith.mulf %154, %157 : vector<1x32xf32>
    %159 = arith.addf %150, %158 : vector<1x32xf32>
    %cst_71 = arith.constant 1.000000e+00 : f32
    %160 = vector.broadcast %cst_71 : f32 to vector<1x8xf32>
    %161 = arith.addf %160, %85 : vector<1x8xf32>
    %162 = arith.mulf %84, %84 : vector<1x8xf32>
    %163 = arith.subf %161, %162 : vector<1x8xf32>
    %164 = math.exp %85 : vector<1x8xf32>
    %165 = arith.subf %163, %164 : vector<1x8xf32>
    %166 = vector.shape_cast %165 : vector<1x8xf32> to vector<1x1x8xf32>
    %cst_72 = arith.constant dense<0.000000e+00> : vector<1xf32>
    %167 = vector.multi_reduction <add>, %166, %cst_72 [1, 2] : vector<1x1x8xf32> to vector<1xf32>
    %168 = vector.shape_cast %167 : vector<1xf32> to vector<1x1x1xf32>
    %169 = vector.extract %168[0, 0, 0] : f32 from vector<1x1x1xf32>
    %170 = vector.broadcast %169 : f32 to vector<1x1xf32>
    %cst_73 = arith.constant -5.000000e-01 : f32
    %171 = vector.broadcast %cst_73 : f32 to vector<1x1xf32>
    %172 = arith.mulf %171, %170 : vector<1x1xf32>
    %cst_74 = arith.constant 0.000000e+00 : f32
    %173 = vector.broadcast %cst_74 : f32 to vector<1x124xf32>
    %174 = tpu.concatenate %148, %173 in 1 : vector<1x4xf32>, vector<1x124xf32> -> vector<1x128xf32>
    %cst_75 = arith.constant 0.000000e+00 : f32
    %175 = vector.broadcast %cst_75 : f32 to vector<1x96xf32>
    %176 = tpu.concatenate %159, %175 in 1 : vector<1x32xf32>, vector<1x96xf32> -> vector<1x128xf32>
    %cst_76 = arith.constant 0.000000e+00 : f32
    %177 = vector.broadcast %cst_76 : f32 to vector<1x127xf32>
    %178 = tpu.concatenate %172, %177 in 1 : vector<1x1xf32>, vector<1x127xf32> -> vector<1x128xf32>
    %cst_77 = arith.constant 0.000000e+00 : f32
    %179 = vector.broadcast %cst_77 : f32 to vector<1x96xf32>
    %180 = tpu.concatenate %68, %179 in 1 : vector<1x32xf32>, vector<1x96xf32> -> vector<1x128xf32>
    %cst_78 = arith.constant 0.000000e+00 : f32
    %181 = vector.broadcast %cst_78 : f32 to vector<1x96xf32>
    %182 = tpu.concatenate %69, %181 in 1 : vector<1x32xf32>, vector<1x96xf32> -> vector<1x128xf32>
    %cst_79 = arith.constant 0.000000e+00 : f32
    %183 = vector.broadcast %cst_79 : f32 to vector<3x128xf32>
    %184 = tpu.concatenate %174, %176, %178, %180, %182, %183 in 0 : vector<1x128xf32>, vector<1x128xf32>, vector<1x128xf32>, vector<1x128xf32>, vector<1x128xf32>, vector<3x128xf32> -> vector<8x128xf32>
    %c0_80 = arith.constant 0 : index
    %c0_81 = arith.constant 0 : index
    %c0_82 = arith.constant 0 : index
    %185 = vector.load %arg5[%c0_80, %c0_81, %c0_82] : memref<1x8x128xf32, #tpu.memory_space<vmem>>, vector<1x8x128xf32>
    %186 = vector.shape_cast %185 : vector<1x8x128xf32> to vector<8x128xf32>
    %187 = vector.shape_cast %184 : vector<8x128xf32> to vector<1x8x128xf32>
    tpu.vector_store %arg5[%c0_80, %c0_81, %c0_82], %187 {strides = array<i32>} : memref<1x8x128xf32, #tpu.memory_space<vmem>>, vector<1x8x128xf32>,
    return
  }
  func.func @transform_0(%arg0: i32) -> (i32, i32, i32) {
    %c0_i32 = arith.constant 0 : i32
    %c0_i32_0 = arith.constant 0 : i32
    %c0_i32_1 = arith.constant 0 : i32
    return %arg0, %c0_i32, %c0_i32_0 : i32, i32, i32
  }
  func.func @transform_1(%arg0: i32) -> (i32, i32, i32) {
    %c0_i32 = arith.constant 0 : i32
    %c0_i32_0 = arith.constant 0 : i32
    %c0_i32_1 = arith.constant 0 : i32
    return %arg0, %c0_i32, %c0_i32_0 : i32, i32, i32
  }
  func.func @transform_2(%arg0: i32) -> (i32, i32, i32) {
    %c0_i32 = arith.constant 0 : i32
    %c0_i32_0 = arith.constant 0 : i32
    %c0_i32_1 = arith.constant 0 : i32
    return %arg0, %c0_i32, %c0_i32_0 : i32, i32, i32
  }
  func.func @transform_3(%arg0: i32) -> (i32, i32) {
    %c0_i32 = arith.constant 0 : i32
    %c0_i32_0 = arith.constant 0 : i32
    %c0_i32_1 = arith.constant 0 : i32
    return %c0_i32, %c0_i32_0 : i32, i32
  }
  func.func @transform_4(%arg0: i32) -> (i32, i32, i32) {
    %c0_i32 = arith.constant 0 : i32
    %c0_i32_0 = arith.constant 0 : i32
    %c0_i32_1 = arith.constant 0 : i32
    return %arg0, %c0_i32, %c0_i32_0 : i32, i32, i32
  }
}

</mosaic_0001>

<bundles_post_ra>
// kernel: compass_encoder_forward.1
= control target key start
LH: loop header
LB: loop body
LE: loop exit
PB: predicated region body
PF: predicated region fallthrough
CT: control target
= control target key end

     0   :  { %9 = vsyncpa [#allocation3], 0  ;;  %s3122_s15 = smov 0   ;;  %s3414_s0 = inlined_call_operand.vmem [shape: f32[4,32,32], index: 0, kind: input, shape index: {}]   ;;  %s3415_s1 = inlined_call_operand.vmem [shape: f32[4,32,8], index: 1, kind: input, shape index: {}]   ;;  %s3416_s2 = inlined_call_operand.vmem [shape: f32[4,2,32], index: 2, kind: input, shape index: {}]   ;;  %s3417_s3 = inlined_call_operand.hbm [shape: f32[192,128], index: 3, kind: input, shape index: {}]   ;;  %s3418_s4 = inlined_call_operand.vmem [shape: f32[4,8,128], index: 4, kind: output, shape index: {}]  }
   0x1 LB: > { %s3128_s16 = sadd.s32 4294967295, %s3083_s15   ;;  %p2474_p0 = scmp.ge.s32.totalorder %s3083_s15, 1  ;;  %s3083_s15 = sphi %s3122_s15, %s15_s15  }
   0x2   : > { %p145_p1 = scmp.lt.s32.totalorder %s3083_s15, 5  ;;  %s3085_s17 = smov [#allocation2]  }
   0x3   : > { %s157_s18 = sshll.u32 %s3085_s17, 4  ;;  %p3419_p3 = scmp.eq.s32.totalorder %s3128_s16, 0  ;;  %s158_s18 = int_to_ptr.vmem [resolvable:$true] %s157_s18 }
   0x4   : > { %p3132_p2 = pnand %p2474_p0, %p145_p1  ;;  %s3045_s23 = scalar_lea.hbm %s3417_s3, 3072 }
   0x5   : > { %p3046_p6 = scmp.ne.s32.totalorder %s3417_s3, %s3045_s23  ;;  %p3052_p10 = scmp.lt.u32.totalorder %s3045_s23, %s3417_s3 }
   0x6   : > { %s3421_s19 = scalar_select %p3132_p2, 1, 0 }
   0x7   : > { %p2969_p4 = pneg %p3132_p2 }
   0x9   : > { %p3141_p5 = pnand %p3419_p3, %p2969_p4 }
   0xb   : > { %p3047_p7 = pneg %p3141_p5 }
   0xd   : > { %p3048_p8 = pnand %p3047_p7, %p3046_p6 }
   0xf   : > { %p3049_p9 = pneg %p3048_p8 }
  0x11   : > { %p3054_p11 = pnand %p3052_p10, %p3049_p9 }
  0x13   : > { %3057 = shalt.err (!%p3054_p11)
}
  0x14   : > { %s3058_s28 = scalar_lea.vmem %s158_s18, 3072  ;;  %p3066_p1 = scmp.lt.s32.totalorder %s158_s18, %s158_s18 }
  0x15   : > { %p3059_p12 = scmp.ne.s32.totalorder %s158_s18, %s3058_s28  ;;  %p3067_p4 = scmp.lt.s32.totalorder %s3058_s28, %s3058_s28 }
  0x17   : > { %p3061_p13 = pnand %p3059_p12, %p3047_p7  ;;  %p3068_p3 = por %p3067_p4, %p3066_p1 }
  0x19   : > { %p3062_p0 = pneg %p3061_p13 }
  0x1b   : > { %p3069_p2 = pnand %p3068_p3, %p3062_p0 }
  0x1d   : > { %3072 = shalt.err (!%p3069_p2)
}
  0x1e   : > { %s3086_s29 = smov 128   ;;  %s3087_s30 = smov 8  }
  0x1f   : > { %2972 = dma.hbm_to_vmem [thread:$0]  (!%p3141_p5), %s3417_s3, 3072, %s158_s18, [#allocation3], %s3086_s29, %s3086_s29, %s3087_s30  }
  0x20   : > { %p3423_p6 = scmp.ne.s32.totalorder %s3421_s19, 0 }
  0x21   : > { %p3424_p8 = scmp.eq.s32.totalorder (!%p3423_p6), %s3128_s16, 0 }
  0x22   : > { %196 = sbr.rel (%p3423_p6) target bundleno = 5449 (0x1549), region = 36 }
  0x29   : > { %3078 = dma.done.wait (%p3424_p8), [#allocation3], 3072   ;;  %p3425_p7 = pmov %p3424_p8 }
  0x2a   : > { %p230_p2 = scmp.lt.s32.totalorder %s3128_s16, 3  ;;  %vm267_vm0 = vcmask 64512   ;;  %v261_v0 = vld [vmem:[#allocation2] sm:$0xff]  ;;  %vm394_vm1 = vcmask 261120   ;;  %v2485_v6 = vld [vmem:[#allocation2 + $0xb0] ss:$0 sm:$0xff] }
  0x2b   : > { %3080 = vsyncadd (%p3425_p7), [#allocation3], 4294964224  ;;  %2671 = vmatprep.subr.mxu0 %v261_v0  ;;  %s3088_s14 = smov 7   ;;  %v389_v42 = vld [vmem:[#allocation2 + $0x8] sm:$0xff]  ;;  %v390_v43 = vld [vmem:[#allocation2 + $0x10] sm:$0xff]  ;;  %vm632_vm2 = vcmask 1044480  }
  0x2c   : > { %s3427_s16 = smov (!%p230_p2, %s3128_s16), 3  ;;  %2672 = vmatpush3.msra.mxu0 %v261_v0  ;;  %v2897_v44 = vpack.c.bf16 %v390_v43, %v389_v42  ;;  %v391_v45 = vld [vmem:[#allocation2 + $0x18] sm:$0x1f]  ;;  %s3089_s17 = smov 14   ;;  %vm609_vm3 = vcmask 56320   ;;  %vm614_vm4 = vcmask 113664  }
  0x2d   : > { %s2558_s7 = sshll.u32 %s3427_s16, 5  ;;  %vm619_vm5 = vcmask 171008   ;;  %vm3091_vm6 = vmmov 0   ;;  %vm794_vm7 = vcmask 15360   ;;  %vm807_vm8 = vcmask 1041408   ;;  %s3093_s18 = smov 8  }
  0x2e   : > { %s239_s10 = scalar_lea.vmem %s3415_s1, %s2558_s7  ;;  %s3182_s13 = scalar_lea.vmem %s3414_s0, %s2558_s7  ;;  %vm1836_vm9 = vcmask 1046528   ;;  %vm1994_vm10 = vcmask 130048   ;;  %vm2342_vm11 = vcmask 57344   ;;  %vm2239_vm12 = vcmask 253952  }
  0x2f   : > { %v252_v1 = vld [vmem:[%s239_s10] sm:$0xff]  ;;  %v253_v2 = vld [vmem:[%s239_s10 + $0x8] sm:$0xff]  ;;  %v254_v3 = vld [vmem:[%s239_s10 + $0x10] sm:$0xff]  ;;  %s3094_s19 = smov 120   ;;  %s2483_s20 = sshll.u32 %s3427_s16, 1 }
  0x30   : > { %2673 = vmatprep.mubr.msk.f32.mxu0 %vm267_vm0, %v252_v1  ;;  %v255_v4 = vld [vmem:[%s239_s10 + $0x18] sm:$0xff]  ;;  %v3185_v5 = vld [vmem:[%s3182_s13] sm:$0xff]  ;;  %v3195_v33 = vld [vmem:[%s3182_s13 + $0x8] sm:$0xff]  ;;  %s3388_s23 = scalar_lea.vmem %s3416_s2, %s2483_s20  ;;  %s3095_s24 = smov 96  }
  0x31   : > { %2674 = vmatmul.mubr.msk.f32.vlgmr.msra.gmra.mrb[0].mxu0 %vm267_vm0, %v253_v2  ;;  %2687 = vmatprep.mubr.msk.f32.mxu1 %vm394_vm1, %v3185_v5  ;;  %v3198_v34 = vld [vmem:[%s3182_s13 + $0x10] sm:$0xff]  ;;  %v3205_v35 = vld [vmem:[%s3182_s13 + $0x18] sm:$0xff]  ;;  %v3090_v2 = vmov 0.0|0.0   ;;  %s3096_s25 = smov 32   ;;  %s2484_s27 = sshll.u32 %s3427_s16, 3 }
  0x32   : > { %2676 = vmatprep.mubr.msk.f32.mxu0 %vm267_vm0, %v254_v3  ;;  %v3092_v3 = vmov 0.0   ;;  %s247_s30 = scalar_lea.vmem %s3418_s4, %s2484_s27 }
  0x35   : > { %2677 = vmatmul.mubr.msk.f32.gmra.mrb[2].mxu0 %vm267_vm0, %v255_v4 }
  0x36   : > { %2701 = vmatprep.mubr.msk.f32.mxu0 %vm394_vm1, %v3185_v5 }
 0x104   : > { %v2675_v7 = vpop.f32.mrb[0].mxu0 }
 0x105   : > { %v352_v8 = vadd.f32 %v2675_v7, %v2485_v6  ;;  %v346_v9 = vpop.f32.mrb[1].mxu0 }
 0x106   : > { %v347_v10 = vadd.f32 %v2485_v6, %v346_v9 }
 0x107   : > { %v2491_v11 = vmul.f32 -1.442695, %v352_v8 }
 0x108   : > { %v2490_v12 = vmul.f32 -1.442695, %v347_v10  ;;  %v2678_v13 = vpop.f32.mrb[2].mxu0 }
 0x109   : > { %2995 = vpow2.f32 %v2491_v11  ;;  %v362_v14 = vadd.f32 %v2678_v13, %v2485_v6  ;;  %v356_v15 = vpop.f32.mrb[3].mxu0  ;;  %v3245_v11 = vld [vmem:[#allocation2 + $0xbb] sm:$0x3] }
 0x10a   : > { %2997 = vpow2.f32 %v2490_v12  ;;  %v357_v16 = vadd.f32 %v2485_v6, %v356_v15  ;;  %v3249_v12 = vld [vmem:[#allocation2 + $0x90] sm:$0xff] }
 0x10b   : > { %v2493_v17 = vmul.f32 -1.442695, %v362_v14  ;;  %v3253_v14 = vld [vmem:[#allocation2 + $0x98] sm:$0xff] }
 0x10c   : > { %v2492_v18 = vmul.f32 -1.442695, %v357_v16  ;;  %v3256_v16 = vld [vmem:[#allocation2 + $0xa0] sm:$0xff] }
 0x10d   : > { %2999 = vpow2.f32 %v2493_v17  ;;  %v3263_v17 = vld [vmem:[#allocation2 + $0xa8] sm:$0xff] }
 0x10e   : > { %3001 = vpow2.f32 %v2492_v18 }
 0x113   : > { %v2996_v19 = vpop.eup %2995 }
 0x114   : > { %v2998_v20 = vpop.eup %2997  ;;  %v378_v21 = vadd.f32 1.0, %v2996_v19 }
 0x115   : > { %v377_v22 = vadd.f32 1.0, %v2998_v20 }
 0x116   : > { %3003 = vrcp.f32 %v378_v21 }
 0x117   : > { %v3000_v23 = vpop.eup %2999  ;;  %3005 = vrcp.f32 %v377_v22 }
 0x118   : > { %v3002_v24 = vpop.eup %3001  ;;  %v380_v25 = vadd.f32 1.0, %v3000_v23 }
 0x119   : > { %v379_v26 = vadd.f32 1.0, %v3002_v24 }
 0x11a   : > { %3007 = vrcp.f32 %v380_v25 }
 0x11b   : > { %3009 = vrcp.f32 %v379_v26 }
 0x120   : > { %v3004_v27 = vpop.eup %3003 }
 0x121   : > { %v3006_v28 = vpop.eup %3005 }
 0x122   : > { %v2881_v29 = vpack.c.bf16 %v3004_v27, %v3006_v28 }
 0x124   : > { %v3191_v30 = vpop.eup %3007  ;;  %2882 = vmatprep.subr.bf16.mxu1 %v2881_v29 }
 0x125   : > { %v3010_v31 = vpop.eup %3009  ;;  %2884 = vmatpush3.bf16.msra.mxu1 %v2881_v29 }
 0x126   : > { %v2885_v32 = vpack.c.bf16 %v3191_v30, %v3010_v31 }
 0x128   : > { %2886 = vmatprep.subr.bf16.mxu1 %v2885_v32 }
 0x129   : > { %2888 = vmatpush3.bf16.msra.mxu1 %v2885_v32 }
 0x12a   : > { %2898 = vmatprep.subr.bf16.mxu1 %v2897_v44 }
 0x12c   : > { %2688 = vmatmul.mubr.msk.f32.vlgmr.msra.gmra.mrb[0].mxu1 %vm394_vm1, %v3195_v33 }
 0x12d   : > { %2690 = vmatprep.mubr.msk.f32.mxu1 %vm394_vm1, %v3198_v34  ;;  %2900 = vmatpush3.bf16.msra.mxu1 %v2897_v44 }
 0x12e   : > { %2711 = vmatprep.subr.msk.mxu1 %vm632_vm2, %v391_v45 }
 0x130   : > { %2691 = vmatmul.mubr.msk.f32.gmra.mrb[2].mxu1 %vm394_vm1, %v3205_v35 }
 0x131   : > { %2712 = vmatpush3.msk.msra.mxu1 %vm632_vm2, %v391_v45 }
 0x132   : > { %2907 = vmatprep.subr.bf16.mxu1 %v3090_v2 }
 0x1ff   : > { %v2689_v36 = vpop.f32.mrb[0].mxu1 }
 0x200   : > { %583 = vrot.lane.b32.xlu0 %v2689_v36, %s3088_s14  ;;  %v473_v37 = vpop.f32.mrb[1].mxu1 }
 0x201   : > { %v2889_v38 = vpack.c.bf16 %v2689_v36, %v473_v37 }
 0x203   : > { %v2692_v39 = vpop.f32.mrb[2].mxu1  ;;  %2890 = vmatprep.subr.bf16.mxu0 %v2889_v38 }
 0x204   : > { %581 = vrot.lane.b32.xlu0 %v473_v37, %s3088_s14  ;;  %v483_v40 = vpop.f32.mrb[3].mxu1  ;;  %2892 = vmatpush3.bf16.msra.mxu0 %v2889_v38 }
 0x205   : > { %v2893_v41 = vpack.c.bf16 %v2692_v39, %v483_v40 }
 0x207   : > { %2894 = vmatprep.subr.bf16.mxu0 %v2893_v41 }
 0x208   : > { %585 = vrot.lane.b32.xlu0 %v483_v40, %s3088_s14  ;;  %2896 = vmatpush3.bf16.msra.mxu0 %v2893_v41 }
 0x209   : > { %2901 = vmatprep.subr.bf16.mxu0 %v3090_v2 }
 0x20b   : > { %2702 = vmatmul.mubr.msk.f32.vlgmr.msra.gmra.mrb[4].mxu0 %vm394_vm1, %v3195_v33 }
 0x20c   : > { %2704 = vmatprep.mubr.msk.f32.mxu0 %vm394_vm1, %v3198_v34 }
 0x20f   : > { %2705 = vmatmul.mubr.msk.f32.gmra.mrb[6].mxu0 %vm394_vm1, %v3205_v35 }
 0x210   : > { %2727 = vmatprep.mubr.msk.f32.mxu0 %vm3091_vm6, %v3092_v3 }
 0x272   : > { %v584_v50 = vpop.permute.xlu0 %583 }
 0x273   : > { %v611_v56 = vsel %vm609_vm3, %v3004_v27, %v584_v50 }
 0x276   : > { %v582_v51 = vpop.permute.xlu0 %581 }
 0x277   : > { %v610_v54 = vsel %vm609_vm3, %v3006_v28, %v582_v51 }
 0x27a   : > { %v586_v53 = vpop.permute.xlu0 %585 }
 0x27b   : > { %v612_v57 = vsel %vm609_vm3, %v3010_v31, %v586_v53 }
 0x2de   : > { %v2703_v46 = vpop.f32.mrb[4].mxu0 }
 0x2df   : > { %599 = vrot.lane.b32.xlu1 %v2703_v46, %s3089_s17  ;;  %v558_v47 = vpop.f32.mrb[5].mxu0  ;;  %v2519_v46 = vld [vmem:[#allocation2 + $0xb1] ss:$0 sm:$0xff] }
 0x2e2   : > { %v2706_v48 = vpop.f32.mrb[6].mxu0 }
 0x2e3   : > { %597 = vrot.lane.b32.xlu1 %v558_v47, %s3089_s17  ;;  %v568_v49 = vpop.f32.mrb[7].mxu0 }
 0x2e4   : > { %601 = vrot.lane.b32.xlu0 %v568_v49, %s3089_s17  ;;  %v2520_v49 = vld [vmem:[#allocation2 + $0xb2] ss:$0 sm:$0xff] }
 0x2e7   : > { %587 = vrot.lane.b32.xlu1 %v2692_v39, %s3088_s14 }
 0x2eb   : > { %603 = vrot.lane.b32.xlu1 %v2706_v48, %s3089_s17 }
 0x351   : > { %v600_v52 = vpop.permute.xlu1 %599 }
 0x352   : > { %v616_v60 = vsel %vm614_vm4, %v611_v56, %v600_v52 }
 0x355   : > { %v598_v55 = vpop.permute.xlu1 %597 }
 0x356   : > { %v615_v58 = vsel %vm614_vm4, %v610_v54, %v598_v55  ;;  %v602_v59 = vpop.permute.xlu0 %601 }
 0x357   : > { %v617_v61 = vsel %vm614_vm4, %v612_v57, %v602_v59  ;;  %2713 = vmatprep.mubr.msk.f32.mxu1 %vm619_vm5, %v615_v58 }
 0x358   : > { %2714 = vmatmul.mubr.msk.f32.vlgmr.msra.gmra.mrb[4].mxu1 %vm619_vm5, %v616_v60 }
 0x359   : > { %v588_v62 = vpop.permute.xlu1 %587  ;;  %2716 = vmatprep.mubr.msk.f32.mxu1 %vm619_vm5, %v617_v61 }
 0x35a   : > { %v613_v63 = vsel %vm609_vm3, %v3191_v30, %v588_v62 }
 0x35d   : > { %v604_v0 = vpop.permute.xlu1 %603 }
 0x35e   : > { %v618_v1 = vsel %vm614_vm4, %v613_v63, %v604_v0 }
 0x35f   : > { %2717 = vmatmul.mubr.msk.f32.gmra.mrb[6].mxu1 %vm619_vm5, %v618_v1 }
 0x360   : > { %2746 = vmatprep.mubr.msk.f32.mxu1 %vm3091_vm6, %v3092_v3 }
 0x42b   : > { %v2715_v4 = vpop.f32.mrb[4].mxu1 }
 0x42c   : > { %v702_v6 = vpop.f32.mrb[5].mxu1 }
 0x42d   : > { %v2902_v7 = vpack.c.bf16 %v2715_v4, %v702_v6 }
 0x42f   : > { %2903 = vmatpush3.bf16.msra.mxu0 %v2902_v7 }
 0x430   : > { %2904 = vmatprep.subr.bf16.mxu0 %v3090_v2 }
 0x432   : > { %v2718_v8 = vpop.f32.mrb[6].mxu1 }
 0x433   : > { %v712_v9 = vpop.f32.mrb[7].mxu1 }
 0x434   : > { %v2905_v10 = vpack.c.bf16 %v2718_v8, %v712_v9 }
 0x436   : > { %2906 = vmatpush3.bf16.msra.mxu0 %v2905_v10 }
 0x439   : > { %2728 = vmatmul.mubr.msk.f32.vlgmr.msra.gmra.mrb[8].mxu0 %vm394_vm1, %v3245_v11 }
 0x43a   : > { %2732 = vmatprep.mubr.msk.f32.mxu0 %vm794_vm7, %v3249_v12 }
 0x50c   : > { %v790_v13 = vpop.f32.mrb[8].mxu0 }
 0x50d   : > { %v2729_v15 = vpop.f32.mrb[9].mxu0  ;;  %2730 = vmatprep.subr.msk.mxu0 %vm807_vm8, %v790_v13 }
 0x50e   : > { %2731 = vmatpush3.msk.msra.mxu0 %vm807_vm8, %v790_v13 }
 0x50f   : > { %2733 = vmatmul.mubr.msk.f32.vlgmr.msra.gmra.mrb[10].mxu0 %vm794_vm7, %v3253_v14 }
 0x510   : > { %2735 = vmatprep.mubr.msk.f32.mxu0 %vm794_vm7, %v3256_v16 }
 0x513   : > { %2736 = vmatmul.mubr.msk.f32.gmra.mrb[12].mxu0 %vm794_vm7, %v3263_v17 }
 0x514   : > { %2765 = vmatprep.mubr.msk.f32.mxu0 %vm394_vm1, %v3185_v5 }
 0x5e2   : > { %v2734_v18 = vpop.f32.mrb[10].mxu0 }
 0x5e3   : > { %v897_v19 = vsub.f32 %v2715_v4, %v2734_v18  ;;  %v877_v20 = vpop.f32.mrb[11].mxu0  ;;  %v1090_v18 = vld [vmem:[#allocation2 + $0x20] sm:$0xff] }
 0x5e4   : > { %v896_v21 = vsub.f32 %v702_v6, %v877_v20 }
 0x5e5   : > { %v901_v22 = vmul.f32 %v897_v19, %v897_v19 }
 0x5e6   : > { %v900_v23 = vmul.f32 %v896_v21, %v896_v21  ;;  %v2737_v24 = vpop.f32.mrb[12].mxu0 }
 0x5e7   : > { %v899_v25 = vsub.f32 %v2718_v8, %v2737_v24  ;;  %v887_v26 = vpop.f32.mrb[13].mxu0 }
 0x5e8   : > { %v2908_v27 = vpack.c.bf16 %v901_v22, %v900_v23  ;;  %v898_v28 = vsub.f32 %v712_v9, %v887_v26 }
 0x5e9   : > { %v903_v29 = vmul.f32 %v899_v25, %v899_v25 }
 0x5ea   : > { %v902_v30 = vmul.f32 %v898_v28, %v898_v28  ;;  %2909 = vmatpush3.bf16.msra.mxu1 %v2908_v27 }
 0x5eb   : > { %2910 = vmatprep.subr.bf16.mxu1 %v3090_v2 }
 0x5ec   : > { %v2911_v31 = vpack.c.bf16 %v903_v29, %v902_v30 }
 0x5ee   : > { %2912 = vmatpush3.bf16.msra.mxu1 %v2911_v31 }
 0x5f1   : > { %2747 = vmatmul.mubr.msk.f32.vlgmr.msra.gmra.mrb[8].mxu1 %vm394_vm1, %v3245_v11 }
 0x5f2   : > { %2751 = vmatprep.mubr.msk.f32.mxu1 %vm794_vm7, %v3249_v12 }
 0x6c4   : > { %v970_v32 = vpop.f32.mrb[8].mxu1 }
 0x6c5   : > { %v2748_v36 = vpop.f32.mrb[9].mxu1  ;;  %2749 = vmatprep.subr.msk.mxu1 %vm807_vm8, %v970_v32 }
 0x6c6   : > { %2750 = vmatpush3.msk.msra.mxu1 %vm807_vm8, %v970_v32 }
 0x6c7   : > { %2752 = vmatmul.mubr.msk.f32.vlgmr.msra.gmra.mrb[10].mxu1 %vm794_vm7, %v3253_v14 }
 0x6c8   : > { %2754 = vmatprep.mubr.msk.f32.mxu1 %vm794_vm7, %v3256_v16 }
 0x6cb   : > { %2755 = vmatmul.mubr.msk.f32.gmra.mrb[12].mxu1 %vm794_vm7, %v3263_v17 }
 0x6cc   : > { %2779 = vmatprep.mubr.msk.f32.mxu1 %vm394_vm1, %v3185_v5 }
 0x79a   : > { %v2753_v37 = vpop.f32.mrb[10].mxu1 }
 0x79b   : > { %v1049_v38 = vadd.f32 1e-05, %v2753_v37  ;;  %v1043_v39 = vpop.f32.mrb[11].mxu1 }
 0x79c   : > { %v1044_v40 = vadd.f32 1e-05, %v1043_v39 }
 0x79d   : > { %3011 = vrsqrt.f32 %v1049_v38 }
 0x79e   : > { %3013 = vrsqrt.f32 %v1044_v40  ;;  %v2756_v41 = vpop.f32.mrb[12].mxu1 }
 0x79f   : > { %v1059_v42 = vadd.f32 1e-05, %v2756_v41  ;;  %v1053_v43 = vpop.f32.mrb[13].mxu1 }
 0x7a0   : > { %v1054_v44 = vadd.f32 1e-05, %v1053_v43 }
 0x7a1   : > { %3015 = vrsqrt.f32 %v1059_v42 }
 0x7a2   : > { %3017 = vrsqrt.f32 %v1054_v44 }
 0x7a7   : > { %v3012_v45 = vpop.eup %3011 }
 0x7a8   : > { %v3014_v47 = vpop.eup %3013  ;;  %v1067_v48 = vmul.f32 %v3012_v45, %v897_v19  ;;  %v1091_v19 = vld [vmem:[#allocation2 + $0x28] sm:$0xff] }
 0x7a9   : > { %v1066_v50 = vmul.f32 %v3014_v47, %v896_v21  ;;  %v2929_v20 = vpack.c.bf16 %v1091_v19, %v1090_v18  ;;  %v1092_v21 = vld [vmem:[#allocation2 + $0x30] sm:$0x1f] }
 0x7aa   : > { %v1075_v51 = vmul.f32 %v2519_v46, %v1067_v48  ;;  %v2547_v18 = vld [vmem:[#allocation2 + $0xb4] ss:$0 sm:$0xff] }
 0x7ab   : > { %v3016_v5 = vpop.eup %3015  ;;  %v1074_v52 = vmul.f32 %v2519_v46, %v1066_v50 }
 0x7ac   : > { %v3018_v53 = vpop.eup %3017  ;;  %v3284_v54 = vadd.f32 %v2520_v49, %v1075_v51  ;;  %v1069_v55 = vmul.f32 %v3016_v5, %v899_v25 }
 0x7ad   : > { %v1082_v56 = vadd.f32 %v2520_v49, %v1074_v52  ;;  %v1068_v57 = vmul.f32 %v3018_v53, %v898_v28 }
 0x7ae   : > { %v1087_v58 = vmax.f32 %v3284_v54, 0.0  ;;  %v1077_v59 = vmul.f32 %v2519_v46, %v1069_v55 }
 0x7af   : > { %v1086_v60 = vmax.f32 %v1082_v56, 0.0  ;;  %v1076_v61 = vmul.f32 %v2519_v46, %v1068_v57 }
 0x7b0   : > { %v3287_v62 = vadd.f32 %v2520_v49, %v1077_v59 }
 0x7b1   : > { %v2913_v63 = vpack.c.bf16 %v1087_v58, %v1086_v60  ;;  %v1084_v0 = vadd.f32 %v2520_v49, %v1076_v61 }
 0x7b2   : > { %v1089_v1 = vmax.f32 %v3287_v62, 0.0 }
 0x7b3   : > { %2914 = vmatprep.subr.bf16.mxu0 %v2913_v63  ;;  %v1088_v4 = vmax.f32 %v1084_v0, 0.0 }
 0x7b4   : > { %2916 = vmatpush3.bf16.msra.mxu0 %v2913_v63 }
 0x7b5   : > { %v2917_v6 = vpack.c.bf16 %v1089_v1, %v1088_v4 }
 0x7b7   : > { %2918 = vmatprep.subr.bf16.mxu0 %v2917_v6 }
 0x7b8   : > { %2920 = vmatpush3.bf16.msra.mxu0 %v2917_v6 }
 0x7b9   : > { %2930 = vmatprep.subr.bf16.mxu0 %v2929_v20 }
 0x7bb   : > { %2766 = vmatmul.mubr.msk.f32.vlgmr.msra.gmra.mrb[14].mxu0 %vm394_vm1, %v3195_v33 }
 0x7bc   : > { %2768 = vmatprep.mubr.msk.f32.mxu0 %vm394_vm1, %v3198_v34  ;;  %2932 = vmatpush3.bf16.msra.mxu0 %v2929_v20 }
 0x7bd   : > { %2789 = vmatprep.subr.msk.mxu0 %vm632_vm2, %v1092_v21 }
 0x7bf   : > { %2769 = vmatmul.mubr.msk.f32.gmra.mrb[16].mxu0 %vm394_vm1, %v3205_v35 }
 0x7c0   : > { %2790 = vmatpush3.msk.msra.mxu0 %vm632_vm2, %v1092_v21 }
 0x88e   : > { %v2767_v7 = vpop.f32.mrb[14].mxu0 }
 0x88f   : > { %1271 = vrot.lane.b32.xlu1 %v2767_v7, %s3088_s14  ;;  %v1161_v8 = vpop.f32.mrb[15].mxu0 }
 0x890   : > { %v2921_v9 = vpack.c.bf16 %v2767_v7, %v1161_v8  ;;  %1269 = vrot.lane.b32.xlu0 %v1161_v8, %s3088_s14 }
 0x892   : > { %v2770_v10 = vpop.f32.mrb[16].mxu0  ;;  %2922 = vmatprep.subr.bf16.mxu1 %v2921_v9 }
 0x893   : > { %2924 = vmatpush3.bf16.msra.mxu1 %v2921_v9  ;;  %1275 = vrot.lane.b32.xlu1 %v2770_v10, %s3088_s14  ;;  %v1171_v13 = vpop.f32.mrb[17].mxu0 }
 0x894   : > { %v2925_v15 = vpack.c.bf16 %v2770_v10, %v1171_v13  ;;  %1273 = vrot.lane.b32.xlu0 %v1171_v13, %s3088_s14 }
 0x896   : > { %2926 = vmatprep.subr.bf16.mxu1 %v2925_v15 }
 0x897   : > { %2928 = vmatpush3.bf16.msra.mxu1 %v2925_v15 }
 0x898   : > { %2933 = vmatprep.subr.bf16.mxu1 %v3090_v2 }
 0x89a   : > { %2780 = vmatmul.mubr.msk.f32.vlgmr.msra.gmra.mrb[14].mxu1 %vm394_vm1, %v3195_v33 }
 0x89b   : > { %2782 = vmatprep.mubr.msk.f32.mxu1 %vm394_vm1, %v3198_v34 }
 0x89e   : > { %2783 = vmatmul.mubr.msk.f32.gmra.mrb[16].mxu1 %vm394_vm1, %v3205_v35 }
 0x89f   : > { %2805 = vmatprep.mubr.msk.f32.mxu1 %vm3091_vm6, %v3092_v3 }
 0x901   : > { %v1272_v23 = vpop.permute.xlu1 %1271 }
 0x902   : > { %v1270_v24 = vpop.permute.xlu0 %1269  ;;  %v1298_v30 = vsel %vm609_vm3, %v1087_v58, %v1272_v23 }
 0x903   : > { %v1297_v28 = vsel %vm609_vm3, %v1086_v60, %v1270_v24 }
 0x905   : > { %v1276_v25 = vpop.permute.xlu1 %1275 }
 0x906   : > { %v1274_v26 = vpop.permute.xlu0 %1273  ;;  %v1300_v39 = vsel %vm609_vm3, %v1089_v1, %v1276_v25 }
 0x907   : > { %v1299_v37 = vsel %vm609_vm3, %v1088_v4, %v1274_v26 }
 0x96d   : > { %v2781_v33 = vpop.f32.mrb[14].mxu1 }
 0x96e   : > { %1287 = vrot.lane.b32.xlu1 %v2781_v33, %s3089_s17  ;;  %v1246_v34 = vpop.f32.mrb[15].mxu1 }
 0x96f   : > { %1285 = vrot.lane.b32.xlu0 %v1246_v34, %s3089_s17 }
 0x971   : > { %v2784_v35 = vpop.f32.mrb[16].mxu1 }
 0x972   : > { %1291 = vrot.lane.b32.xlu1 %v2784_v35, %s3089_s17  ;;  %v1256_v22 = vpop.f32.mrb[17].mxu1 }
 0x973   : > { %1289 = vrot.lane.b32.xlu0 %v1256_v22, %s3089_s17 }
 0x9e0   : > { %v1288_v27 = vpop.permute.xlu1 %1287 }
 0x9e1   : > { %v1286_v29 = vpop.permute.xlu0 %1285  ;;  %v1302_v32 = vsel %vm614_vm4, %v1298_v30, %v1288_v27 }
 0x9e2   : > { %v1301_v31 = vsel %vm614_vm4, %v1297_v28, %v1286_v29 }
 0x9e3   : > { %2791 = vmatprep.mubr.msk.f32.mxu0 %vm619_vm5, %v1301_v31 }
 0x9e4   : > { %2792 = vmatmul.mubr.msk.f32.vlgmr.msra.gmra.mrb[18].mxu0 %vm619_vm5, %v1302_v32  ;;  %v1292_v36 = vpop.permute.xlu1 %1291 }
 0x9e5   : > { %v1290_v38 = vpop.permute.xlu0 %1289  ;;  %v1304_v41 = vsel %vm614_vm4, %v1300_v39, %v1292_v36  ;;  %v1913_v39 = vld [vmem:[#allocation2 + $0x48] sm:$0xff] }
 0x9e6   : > { %v1303_v40 = vsel %vm614_vm4, %v1299_v37, %v1290_v38  ;;  %v1827_v37 = vld [vmem:[#allocation2 + $0x38] sm:$0x7f]  ;;  %v1912_v38 = vld [vmem:[#allocation2 + $0x40] sm:$0xff] }
 0x9e7   : > { %2794 = vmatprep.mubr.msk.f32.mxu0 %vm619_vm5, %v1303_v40  ;;  %v2952_v40 = vpack.c.bf16 %v1913_v39, %v1912_v38 }
 0x9e8   : > { %2795 = vmatmul.mubr.msk.f32.gmra.mrb[20].mxu0 %vm619_vm5, %v1304_v41 }
 0x9e9   : > { %2810 = vmatprep.mubr.msk.f32.mxu0 %vm794_vm7, %v3249_v12 }
 0xab7   : > { %v2793_v42 = vpop.f32.mrb[18].mxu0 }
 0xab8   : > { %v1386_v43 = vpop.f32.mrb[19].mxu0 }
 0xab9   : > { %v2934_v44 = vpack.c.bf16 %v2793_v42, %v1386_v43 }
 0xabb   : > { %v2796_v45 = vpop.f32.mrb[20].mxu0  ;;  %2935 = vmatpush3.bf16.msra.mxu1 %v2934_v44 }
 0xabc   : > { %v1396_v46 = vpop.f32.mrb[21].mxu0  ;;  %2936 = vmatprep.subr.bf16.mxu1 %v3090_v2 }
 0xabd   : > { %v2937_v47 = vpack.c.bf16 %v2796_v45, %v1396_v46 }
 0xabf   : > { %2938 = vmatpush3.bf16.msra.mxu1 %v2937_v47 }
 0xac0   : > { %2939 = vmatprep.subr.bf16.mxu1 %v3090_v2 }
 0xac2   : > { %2806 = vmatmul.mubr.msk.f32.vlgmr.msra.gmra.mrb[18].mxu1 %vm394_vm1, %v3245_v11 }
 0xac3   : > { %2824 = vmatprep.mubr.msk.f32.mxu1 %vm3091_vm6, %v3092_v3 }
 0xb95   : > { %v1471_v48 = vpop.f32.mrb[18].mxu1 }
 0xb96   : > { %v2807_v49 = vpop.f32.mrb[19].mxu1  ;;  %2808 = vmatprep.subr.msk.mxu0 %vm807_vm8, %v1471_v48 }
 0xb97   : > { %2809 = vmatpush3.msk.msra.mxu0 %vm807_vm8, %v1471_v48  ;;  %v1991_v49 = vld [vmem:[#allocation2 + $0x60] sm:$0xff] }
 0xb98   : > { %2811 = vmatmul.mubr.msk.f32.vlgmr.msra.gmra.mrb[22].mxu0 %vm794_vm7, %v3253_v14 }
 0xb99   : > { %2813 = vmatprep.mubr.msk.f32.mxu0 %vm794_vm7, %v3256_v16 }
 0xb9c   : > { %2814 = vmatmul.mubr.msk.f32.gmra.mrb[24].mxu0 %vm794_vm7, %v3263_v17 }
 0xb9d   : > { %2829 = vmatprep.mubr.msk.f32.mxu0 %vm794_vm7, %v3249_v12 }
 0xc6b   : > { %v2812_v50 = vpop.f32.mrb[22].mxu0 }
 0xc6c   : > { %v1564_v51 = vsub.f32 %v2793_v42, %v2812_v50  ;;  %v1544_v5 = vpop.f32.mrb[23].mxu0  ;;  %v1992_v50 = vld [vmem:[#allocation2 + $0x68] sm:$0xff] }
 0xc6d   : > { %v1563_v52 = vsub.f32 %v1386_v43, %v1544_v5  ;;  %v1915_v43 = vld [vmem:[#allocation2 + $0x58] sm:$0xff]  ;;  %v1916_v5 = vld [vmem:[#allocation2 + $0xb6] sm:$0x1] }
 0xc6e   : > { %v1568_v53 = vmul.f32 %v1564_v51, %v1564_v51 }
 0xc6f   : > { %v1567_v54 = vmul.f32 %v1563_v52, %v1563_v52  ;;  %v2815_v55 = vpop.f32.mrb[24].mxu0 }
 0xc70   : > { %v1566_v56 = vsub.f32 %v2796_v45, %v2815_v55  ;;  %v1554_v57 = vpop.f32.mrb[25].mxu0  ;;  %v2549_v45 = vld [vmem:[#allocation2 + $0xb5] ss:$0 sm:$0xff]  ;;  %v1993_v55 = vld [vmem:[#allocation2 + $0xb7] sm:$0x1] }
 0xc71   : > { %v2940_v58 = vpack.c.bf16 %v1568_v53, %v1567_v54  ;;  %v1565_v59 = vsub.f32 %v1396_v46, %v1554_v57 }
 0xc72   : > { %v1570_v60 = vmul.f32 %v1566_v56, %v1566_v56 }
 0xc73   : > { %v1569_v61 = vmul.f32 %v1565_v59, %v1565_v59  ;;  %2941 = vmatpush3.bf16.msra.mxu1 %v2940_v58 }
 0xc74   : > { %2942 = vmatprep.subr.bf16.mxu1 %v3090_v2 }
 0xc75   : > { %v2943_v62 = vpack.c.bf16 %v1570_v60, %v1569_v61 }
 0xc77   : > { %2944 = vmatpush3.bf16.msra.mxu1 %v2943_v62  ;;  %v2077_v62 = vld [vmem:[#allocation2 + $0x70] sm:$0xff] }
 0xc78   : > { %2945 = vmatprep.subr.bf16.mxu1 %v3090_v2 }
 0xc7a   : > { %2825 = vmatmul.mubr.msk.f32.vlgmr.msra.gmra.mrb[20].mxu1 %vm394_vm1, %v3245_v11 }
 0xc7b   : > { %2843 = vmatprep.mubr.msk.f32.mxu1 %vm3091_vm6, %v3092_v3 }
 0xd4d   : > { %v1637_v12 = vpop.f32.mrb[20].mxu1 }
 0xd4e   : > { %v2826_v63 = vpop.f32.mrb[21].mxu1  ;;  %2827 = vmatprep.subr.msk.mxu0 %vm807_vm8, %v1637_v12 }
 0xd4f   : > { %2828 = vmatpush3.msk.msra.mxu0 %vm807_vm8, %v1637_v12 }
 0xd50   : > { %2830 = vmatmul.mubr.msk.f32.vlgmr.msra.gmra.mrb[26].mxu0 %vm794_vm7, %v3253_v14  ;;  %2846 = vmatprep.subr.mxu0 %v3092_v3 }
 0xd51   : > { %2832 = vmatprep.mubr.msk.f32.mxu0 %vm794_vm7, %v3256_v16  ;;  %v2546_v16 = vld [vmem:[#allocation2 + $0xb3] ss:$0 sm:$0xff]  ;;  %2847 = vmatpush3.msk.msra.mxu0 %vm1836_vm9, %v1827_v37  ;;  %vm2355_vm9 = vcmask 31744  }
 0xd52   : > { %2957 = vmatprep.subr.bf16.mxu0 %v3090_v2 }
 0xd54   : > { %2833 = vmatmul.mubr.msk.f32.gmra.mrb[28].mxu0 %vm794_vm7, %v3263_v17  ;;  %vm2362_vm7 = vcmask 7168  }
 0xd55   : > { %2848 = vmatprep.mubr.msk.f32.mxu0 %vm3091_vm6, %v3092_v3 }
 0xe23   : > { %v2831_v0 = vpop.f32.mrb[26].mxu0 }
 0xe24   : > { %v1716_v1 = vadd.f32 1e-05, %v2831_v0  ;;  %v1710_v4 = vpop.f32.mrb[27].mxu0 }
 0xe25   : > { %v1711_v6 = vadd.f32 1e-05, %v1710_v4 }
 0xe26   : > { %3019 = vrsqrt.f32 %v1716_v1 }
 0xe27   : > { %3021 = vrsqrt.f32 %v1711_v6  ;;  %v2834_v7 = vpop.f32.mrb[28].mxu0 }
 0xe28   : > { %v1726_v8 = vadd.f32 1e-05, %v2834_v7  ;;  %v1720_v14 = vpop.f32.mrb[29].mxu0  ;;  %v1910_v7 = vld [vmem:[%s3388_s23] sm:$0x1] }
 0xe29   : > { %v1721_v9 = vadd.f32 1e-05, %v1720_v14 }
 0xe2a   : > { %3023 = vrsqrt.f32 %v1726_v8 }
 0xe2b   : > { %3025 = vrsqrt.f32 %v1721_v9 }
 0xe30   : > { %v3020_v10 = vpop.eup %3019 }
 0xe31   : > { %v3022_v13 = vpop.eup %3021  ;;  %v1734_v15 = vmul.f32 %v3020_v10, %v1564_v51  ;;  %v2958_v51 = vpack.c.bf16 %v1992_v50, %v1991_v49  ;;  %v2153_v10 = vld [vmem:[#allocation2 + $0x78] sm:$0xff] }
 0xe32   : > { %v1733_v17 = vmul.f32 %v3022_v13, %v1563_v52 }
 0xe33   : > { %v1742_v19 = vmul.f32 %v2546_v16, %v1734_v15  ;;  %v2078_v15 = vld [vmem:[#allocation2 + $0xb8] sm:$0x1] }
 0xe34   : > { %v3024_v20 = vpop.eup %3023  ;;  %v1741_v21 = vmul.f32 %v2546_v16, %v1733_v17 }
 0xe35   : > { %v3026_v33 = vpop.eup %3025  ;;  %v1736_v34 = vmul.f32 %v3024_v20, %v1566_v56  ;;  %v1750_v35 = vadd.f32 %v2547_v18, %v1742_v19 }
 0xe36   : > { %v1735_v22 = vmul.f32 %v3026_v33, %v1565_v59  ;;  %v1749_v23 = vadd.f32 %v2547_v18, %v1741_v21  ;;  %v2155_v21 = vld [vmem:[#allocation2 + $0xb9] sm:$0x1] }
 0xe37   : > { %v1754_v24 = vmax.f32 %v1750_v35, 0.0  ;;  %v1744_v25 = vmul.f32 %v2546_v16, %v1736_v34 }
 0xe38   : > { %v1753_v26 = vmax.f32 %v1749_v23, 0.0  ;;  %v1743_v27 = vmul.f32 %v2546_v16, %v1735_v22  ;;  %v2154_v16 = vld [vmem:[#allocation2 + $0x80] sm:$0xff] }
 0xe39   : > { %v1752_v28 = vadd.f32 %v2547_v18, %v1744_v25  ;;  %v2961_v13 = vpack.c.bf16 %v2154_v16, %v2153_v10 }
 0xe3a   : > { %v2946_v29 = vpack.c.bf16 %v1754_v24, %v1753_v26  ;;  %v1751_v30 = vadd.f32 %v2547_v18, %v1743_v27 }
 0xe3b   : > { %v1756_v31 = vmax.f32 %v1752_v28, 0.0 }
 0xe3c   : > { %2947 = vmatpush3.bf16.msra.mxu1 %v2946_v29  ;;  %v1755_v32 = vmax.f32 %v1751_v30, 0.0 }
 0xe3d   : > { %2948 = vmatprep.subr.bf16.mxu1 %v3090_v2 }
 0xe3e   : > { %v2949_v36 = vpack.c.bf16 %v1756_v31, %v1755_v32 }
 0xe40   : > { %2950 = vmatpush3.bf16.msra.mxu1 %v2949_v36  ;;  %v1911_v36 = vld [vmem:[%s3388_s23 + $0x1] sm:$0x1] }
 0xe41   : > { %2951 = vmatprep.subr.bf16.mxu1 %v3090_v2 }
 0xe43   : > { %2844 = vmatmul.mubr.msk.f32.vlgmr.msra.gmra.mrb[22].mxu1 %vm394_vm1, %v3245_v11  ;;  %v1914_v11 = vld [vmem:[#allocation2 + $0x50] sm:$0xff] }
 0xe44   : > { %2859 = vmatprep.mubr.msk.f32.mxu1 %vm3091_vm6, %v3092_v3  ;;  %2953 = vmatpush3.bf16.msra.mxu1 %v2952_v40  ;;  %v2955_v44 = vpack.c.bf16 %v1915_v43, %v1914_v11 }
 0xe45   : > { %2954 = vmatprep.subr.bf16.mxu1 %v3090_v2 }
 0xe48   : > { %2956 = vmatpush3.bf16.msra.mxu1 %v2955_v44 }
 0xe49   : > { %2960 = vmatprep.subr.bf16.mxu1 %v3090_v2 }
 0xf16   : > { %v1823_v41 = vpop.f32.mrb[22].mxu1 }
 0xf17   : > { %2849 = vmatmul.mubr.msk.f32.vlgmr.msra.gmra.mrb[30].mxu0 %vm609_vm3, %v1823_v41  ;;  %v2845_v42 = vpop.f32.mrb[23].mxu1 }
 0xf18   : > { %2866 = vmatprep.mubr.msk.f32.mxu0 %vm3091_vm6, %v3092_v3  ;;  %2959 = vmatpush3.bf16.msra.mxu0 %v2958_v51 }
 0xf19   : > { %2869 = vmatprep.subr.mxu0 %v3092_v3 }
 0xfea   : > { %v1906_v46 = vpop.f32.mrb[30].mxu0 }
 0xfeb   : > { %v3374_v47 = vadd.f32 %v2549_v45, %v1906_v46  ;;  %v2850_v48 = vpop.f32.mrb[31].mxu0 }
 0xfed   : > { %2860 = vmatmul.mubr.msk.f32.vlgmr.msra.gmra.mrb[24].mxu1 %vm394_vm1, %v3374_v47  ;;  %v2243_v50 = vmul.f32 %v3374_v47, %v3374_v47 }
 0xfee   : > { %2878 = vmatprep.mubr.msk.f32.mxu1 %vm3091_vm6, %v3092_v3  ;;  %2962 = vmatpush3.bf16.msra.mxu1 %v2961_v13 }
0x10c0   : > { %v1986_v52 = vpop.f32.mrb[24].mxu1 }
0x10c1   : > { %v1987_v2 = vadd.f32 %v1986_v52, %v1916_v5  ;;  %v2861_v53 = vpop.f32.mrb[25].mxu1  ;;  %v2244_v5 = vsel %vm2239_vm12, %v2243_v50, 0.0 }
0x10c3   : > { %v1990_v54 = vmax.f32 %v1987_v2, 0.0 }
0x10c5   : > { %2867 = vmatmul.mubr.msk.f32.vlgmr.msra.gmra.mrb[32].mxu0 %vm1994_vm10, %v1990_v54 }
0x10c6   : > { %2871 = vmatprep.mubr.msk.f32.mxu0 %vm3091_vm6, %v3092_v3  ;;  %2870 = vmatpush3.msra.mxu0 %v2077_v62 }
0x1198   : > { %v2064_v56 = vpop.f32.mrb[32].mxu0 }
0x1199   : > { %v2065_v57 = vadd.f32 %v2064_v56, %v1993_v55  ;;  %v2868_v58 = vpop.f32.mrb[33].mxu0 }
0x119b   : > { %v2068_v59 = vmul.f32 0.5, %v2065_v57  ;;  %v2329_v60 = vmul.f32 %v2065_v57, %v2065_v57  ;;  %v2335_v63 = vmul.f32 1.442695, %v2065_v57  ;;  %v2328_v0 = vadd.f32 1.0, %v2065_v57 }
0x119d   : > { %v2069_v61 = vmul.f32 1.442695, %v2068_v59  ;;  %2331 = vrot.lane.b32.xlu1 %v2329_v60, %s3093_s18 }
0x119f   : > { %3027 = vpow2.f32 %v2069_v61 }
0x11a0   : > { %3029 = vpow2.f32 %v2335_v63 }
0x11a9   : > { %v3028_v12 = vpop.eup %3027 }
0x11aa   : > { %2072 = vrot.lane.b32.xlu0 %v3028_v12, %s3094_s19  ;;  %v3030_v4 = vpop.eup %3029 }
0x120f   : > { %v2332_v3 = vpop.permute.xlu1 %2331 }
0x1210   : > { %v2334_v1 = vsub.f32 %v2328_v0, %v2332_v3 }
0x1212   : > { %v2337_v6 = vsub.f32 %v2334_v1, %v3030_v4 }
0x1214   : > { %2339 = vrot.lane.b32.xlu0 %v2337_v6, %s3094_s19 }
0x121c   : > { %v2073_v8 = vpop.permute.xlu0 %2072 }
0x121d   : > { %v2075_v14 = vmul.f32 %v2073_v8, %v1910_v7 }
0x121f   : > { %v2076_v9 = vadd.f32 %v2075_v14, %v2065_v57 }
0x1221   : > { %2872 = vmatmul.mubr.msk.f32.vlgmr.msra.gmra.mrb[34].mxu0 %vm267_vm0, %v2076_v9 }
0x1286   : > { %v2340_v29 = vpop.permute.xlu0 %2339 }
0x1287   : > { %v2343_v30 = vsel %vm2342_vm11, %v2340_v29, 0.0  ;;  %vm2377_vm11 = vcmask 1042432  }
0x12f4   : > { %v2148_v17 = vpop.f32.mrb[34].mxu0 }
0x12f5   : > { %v2149_v18 = vadd.f32 %v2148_v17, %v2078_v15  ;;  %v2873_v19 = vpop.f32.mrb[35].mxu0 }
0x12f7   : > { %v2152_v20 = vmax.f32 %v2149_v18, 0.0 }
0x12f9   : > { %2879 = vmatmul.mubr.msk.f32.vlgmr.msra.gmra.mrb[26].mxu1 %vm1994_vm10, %v2152_v20  ;;  %vm2374_vm10 = vcmask 1040384  }
0x13cc   : > { %v2225_v33 = vpop.f32.mrb[26].mxu1 }
0x13cd   : > { %v2226_v34 = vadd.f32 %v2225_v33, %v2155_v21  ;;  %v2880_v35 = vpop.f32.mrb[27].mxu1  ;;  %v2289_v21 = vld [vmem:[#allocation2 + $0x88] sm:$0xf] }
0x13cf   : > { %v2229_v22 = vmul.f32 0.5, %v2226_v34  ;;  %v2313_v23 = vsub.f32 0.0, %v2226_v34  ;;  %v2308_v31 = vrot.slane %v2226_v34, 7  ;;  %v2306_v60 = vadd.f32 1.6514962, %v2226_v34 }
0x13d1   : > { %v2230_v24 = vmul.f32 1.442695, %v2229_v22  ;;  %v2314_v25 = vmul.f32 1.442695, %v2313_v23  ;;  %v2310_v32 = vsub.f32 %v3374_v47, %v2308_v31 }
0x13d3   : > { %3031 = vpow2.f32 %v2230_v24  ;;  %v2311_v37 = vmul.f32 %v2310_v32, %v2310_v32 }
0x13d4   : > { %3033 = vpow2.f32 %v2314_v25 }
0x13d5   : > { %v2312_v40 = vmul.f32 0.5, %v2311_v37 }
0x13dd   : > { %v3032_v26 = vpop.eup %3031 }
0x13de   : > { %v3034_v27 = vpop.eup %3033  ;;  %2233 = vrot.lane.b32.xlu0 %v3032_v26, %s3095_s24 }
0x13df   : > { %v2317_v28 = vrot.slane %v3034_v27, 7  ;;  %v2296_v27 = vrot.slane %v2289_v21, 2 }
0x13e1   : > { %2318 = vrot.lane.b32.xlu1 %v2317_v28, %s3095_s24 }
0x1405   : > { %2344 = vadd.xlane.f32.xlu1 %v2343_v30 }
0x1450   : > { %v2234_v38 = vpop.permute.xlu0 %2233 }
0x1451   : > { %v2236_v39 = vmul.f32 %v2234_v38, %v1911_v36  ;;  %v2300_v36 = vrot.slane %v2289_v21, 3 }
0x1453   : > { %v2237_v41 = vadd.f32 %v2236_v39, %v2226_v34  ;;  %v2319_v42 = vpop.permute.xlu1 %2318  ;;  %v2292_v34 = vrot.slane %v2289_v21, 1 }
0x1454   : > { %v2321_v11 = vmul.f32 %v2319_v42, %v2312_v40 }
0x1455   : > { %v2247_v43 = vmul.f32 %v2237_v41, %v2237_v41  ;;  %v2238_v46 = vmul.f32 %v2237_v41, %v3374_v47  ;;  %v2262_v49 = vsub.f32 %v3374_v47, %v2237_v41 }
0x1456   : > { %v2323_v44 = vrot.slane %v2321_v11, 1  ;;  %v2304_v11 = vld [vmem:[#allocation2 + $0xba] sm:$0x1] }
0x1457   : > { %v2248_v45 = vsel %vm2239_vm12, %v2247_v43, 0.0  ;;  %v2240_v48 = vsel %vm2239_vm12, %v2238_v46, 0.0  ;;  %v2263_v51 = vadd.f32 1e-06, %v2262_v49  ;;  %v2364_v46 = vsel %vm394_vm1, %v3374_v47, 0.0 }
0x1458   : > { %2324 = vrot.lane.b32.xlu0 %v2323_v44, %s3096_s25  ;;  %2249 = vadd.xlane.f32.xlu1 %v2248_v45 }
0x1459   : > { %v2264_v52 = vmul.f32 %v2263_v51, %v2263_v51 }
0x145b   : > { %v2265_v2 = vsel %vm2239_vm12, %v2264_v52, 0.0  ;;  %vm2379_vm12 = vcmask 1043456  }
0x145c   : > { %2241 = vadd.xlane.f32.xlu1 %v2240_v48 }
0x1477   : > { %2245 = vadd.xlane.f32.xlu0 %v2244_v5  ;;  %v2372_v5 = vrot.slane %v2364_v46, 5 }
0x147b   : > { %2266 = vadd.xlane.f32.xlu0 %v2265_v2 }
0x1492   : > { %v2345_v53 = vpop.xlane.xlu1 %2344 }
0x1493   : > { %v2346_v54 = vrot.slane %v2345_v53, 4 }
0x1495   : > { %v2347_v55 = vadd.f32 %v2346_v54, %v2345_v53 }
0x1497   : > { %v2348_v56 = vrot.slane %v2347_v55, 2 }
0x1499   : > { %v2349_v57 = vadd.f32 %v2348_v56, %v2347_v55 }
0x149b   : > { %v2350_v58 = vrot.slane %v2349_v57, 1 }
0x149d   : > { %v2351_v59 = vadd.f32 %v2350_v58, %v2349_v57 }
0x149f   : > { %2963 = vpush %v2351_v59 }
0x14ca   : > { %v2325_v61 = vpop.permute.xlu0 %2324 }
0x14cb   : > { %v2327_v62 = vadd.f32 %v2325_v61, %v2306_v60 }
0x14cd   : > { %2358 = vrot.lane.b32.xlu0 %v2327_v62, %s3095_s24 }
0x14d0   : > { %s2964_s26 = spop %2963 }
0x14d1   : > { %v2353_v39 = vstv %s2964_s26 }
0x14d2   : > { %v2354_v42 = vmul.f32 -0.5, %v2353_v39 }
0x14d4   : > { %v2363_v44 = vsel %vm2362_vm7, %v2354_v42, 0.0 }
0x14d5   : > { %v2369_v50 = vrot.slane %v2363_v44, 6 }
0x14e5   : > { %v2250_v12 = vpop.xlane.xlu1 %2249 }
0x14e6   : > { %vm2284_vm5 = vcmp.eq.f32.partialorder %v2250_v12, inf  ;;  %v2287_v31 = vand.u32 2147483648, %v2250_v12  ;;  %vm2286_vm6 = vcmp.eq.f32.partialorder %v2250_v12, 0.0 }
0x14e9   : > { %v2242_v15 = vpop.xlane.xlu1 %2241 }
0x1504   : > { %v2246_v63 = vpop.xlane.xlu0 %2245 }
0x1505   : > { %v2251_v0 = vmul.f32 %v2250_v12, %v2246_v63  ;;  %vm2277_vm3 = vcmp.eq.f32.partialorder %v2246_v63, inf  ;;  %v2280_v25 = vand.u32 2147483648, %v2246_v63  ;;  %vm2279_vm4 = vcmp.eq.f32.partialorder %v2246_v63, 0.0 }
0x1507   : > { %3035 = vrsqrt.f32 %v2251_v0  ;;  %vm2254_vm13 = vcmp.eq.f32.partialorder %v2251_v0, inf  ;;  %v2257_v4 = vand.u32 2147483648, %v2251_v0  ;;  %vm2256_vm14 = vcmp.eq.f32.partialorder %v2251_v0, 0.0 }
0x1508   : > { %v2267_v7 = vpop.xlane.xlu0 %2266 }
0x1509   : > { %3037 = vrsqrt.f32 %v2267_v7  ;;  %vm2270_vm15 = vcmp.eq.f32.partialorder %v2267_v7, inf  ;;  %v2273_v33 = vand.u32 2147483648, %v2267_v7  ;;  %vm2272_vm0 = vcmp.eq.f32.partialorder %v2267_v7, 0.0 }
0x150a   : > { %3039 = vrsqrt.f32 %v2246_v63 }
0x1511   : > { %v3036_v3 = vpop.eup %3035 }
0x1512   : > { %v2253_v1 = vmul.f32 %v3036_v3, %v2251_v0 }
0x1513   : > { %v3038_v9 = vpop.eup %3037 }
0x1514   : > { %v2255_v6 = vsel %vm2254_vm13, %v2251_v0, %v2253_v1  ;;  %v3040_v10 = vpop.eup %3039  ;;  %v2269_v16 = vmul.f32 %v3038_v9, %v2267_v7 }
0x1515   : > { %v2258_v8 = vsel %vm2256_vm14, %v2257_v4, %v2255_v6  ;;  %v2276_v17 = vmul.f32 %v3040_v10, %v2246_v63 }
0x1516   : > { %v2259_v14 = vmax.f32 %v2258_v8, 1e-06  ;;  %v2271_v18 = vsel %vm2270_vm15, %v2267_v7, %v2269_v16 }
0x1517   : > { %v2274_v35 = vsel %vm2272_vm0, %v2273_v33, %v2271_v18  ;;  %v2278_v23 = vsel %vm2277_vm3, %v2246_v63, %v2276_v17 }
0x1518   : > { %3041 = vrcp.f32 %v2259_v14  ;;  %v2294_v26 = vmul.f32 %v2292_v34, %v2274_v35  ;;  %v2281_v28 = vsel %vm2279_vm4, %v2280_v25, %v2278_v23 }
0x1519   : > { %3043 = vrsqrt.f32 %v2250_v12  ;;  %v2298_v32 = vmul.f32 %v2296_v27, %v2281_v28 }
0x1522   : > { %v3042_v13 = vpop.eup %3041 }
0x1523   : > { %v2261_v19 = vmul.f32 %v3042_v13, %v2242_v15  ;;  %v3044_v20 = vpop.eup %3043 }
0x1524   : > { %v2283_v22 = vmul.f32 %v3044_v20, %v2250_v12 }
0x1525   : > { %v2290_v24 = vmul.f32 %v2289_v21, %v2261_v19 }
0x1526   : > { %v2285_v29 = vsel %vm2284_vm5, %v2250_v12, %v2283_v22 }
0x1527   : > { %v2295_v30 = vadd.f32 %v2294_v26, %v2290_v24  ;;  %v2288_v37 = vsel %vm2286_vm6, %v2287_v31, %v2285_v29 }
0x1528   : > { %v2302_v40 = vmul.f32 %v2300_v36, %v2288_v37 }
0x1529   : > { %v2299_v38 = vadd.f32 %v2298_v32, %v2295_v30 }
0x152b   : > { %v2303_v41 = vadd.f32 %v2302_v40, %v2299_v38 }
0x152d   : > { %v2305_v43 = vadd.f32 %v2304_v11, %v2303_v41 }
0x152f   : > { %v2356_v51 = vsel %vm2355_vm9, %v2305_v43, 0.0 }
0x153f   : > { %v2359_v45 = vpop.permute.xlu0 %2358 }
0x1540   : > { %v2361_v48 = vsel %vm394_vm1, %v2359_v45, 0.0 }
0x1541   : > { %v2366_v49 = vrot.slane %v2361_v48, 7 }
0x1543   : > { %v2375_v52 = vsel %vm2374_vm10, %v2356_v51, %v2366_v49 }
0x1544   : > { %v2376_v2 = vsel %vm807_vm8, %v2375_v52, %v2369_v50 }
0x1545   : > { %v2378_v53 = vsel %vm2377_vm11, %v2376_v2, %v2372_v5 }
0x1546   : > { %v2380_v54 = vsel %vm2379_vm12, %v2378_v53, %v2372_v5 }
0x1547   : > { %v2381_v47 = vsel %vm632_vm2, %v2380_v54, 0.0 }
0x1548   : > { %2382 = vst [vmem:[%s247_s30] sm:$0xff] %v2381_v47 }
0x1549 PF: > { %s15_s15 = sadd.s32 1, %s3083_s15  }
0x154a   : > { %p12_p3 = scmp.ge.s32.totalorder %s15_s15, 6  }
0x154c   :  { %14 = sbr.rel (!%p12_p3) target bundleno = 1 (0x1), region = 77 }
0x1553   :  { %2402 = vsyncpa [#allocation3], 1 }
0x1554   :  { %2404 = vsyncpa [#allocation3 + $0x1], 1 }

</bundles_post_ra>
